<compile_context>
chip_gen: v7x
topology: tpu7x:2x2x1
jax: 0.10.0
libtpu: 0.0.40
codegen_flags: <defaults>
</compile_context>

<pallas_src>
import jax
import jax.numpy as jnp
from jax.experimental import pallas as pl
from jax.experimental.pallas import tpu as pltpu

_BIG = 1e9  # penalty replacing the boolean fg/valid gather of the reference


def _log_sigmoid(x):
    # = -softplus(-x); two EUP passes (exp, log) per element, numerically stable
    return jnp.minimum(x, 0.0) - jnp.log(1.0 + jnp.exp(-jnp.abs(x)))


# ----------------------------------------------------------------------------
# Kernel 1: fused multi-level decode, feature-major (5+C, A_pad), grid=(B,)
# ----------------------------------------------------------------------------
def _decode_kernel(pred_ref, gxy_ref, es_ref, out_ref):
    es = es_ref[...]                                        # (1, A)
    out_ref[0:2, :] = (pred_ref[0:2, :] + gxy_ref[...]) * es
    out_ref[2:4, :] = jnp.exp(pred_ref[2:4, :]) * es
    out_ref[4:, :] = pred_ref[4:, :]


def _decode(pred_fm, gxy, es):
    B, n_ch, A = pred_fm.shape
    return pl.pallas_call(
        _decode_kernel,
        out_shape=jax.ShapeDtypeStruct((B, n_ch, A), jnp.float32),
        grid=(B,),
        in_specs=[
            pl.BlockSpec((None, n_ch, A), lambda b: (b, 0, 0)),
            pl.BlockSpec((2, A), lambda b: (0, 0)),          # resident grid table
            pl.BlockSpec((1, A), lambda b: (0, 0)),          # resident strides
        ],
        out_specs=pl.BlockSpec((None, n_ch, A), lambda b: (b, 0, 0)),
        compiler_params=pltpu.CompilerParams(dimension_semantics=("parallel",)),
    )(pred_fm, gxy, es)


# ----------------------------------------------------------------------------
# Kernel 2: batched SimOTA pairwise cost / IoU, grid=(B,)
# ----------------------------------------------------------------------------
def _cost_kernel(gt_ref, onehot_ref, valid_ref, gxy_ref, es_ref, av_ref, dec_ref,
                 cost_ref, iou_ref):
    gt = gt_ref[...]                                        # (G, 4)  cx cy w h
    g_cx = gt[:, 0:1]
    g_cy = gt[:, 1:2]
    g_w = gt[:, 2:3]
    g_h = gt[:, 3:4]

    es = es_ref[...]                                        # (1, A)
    x_c = (gxy_ref[0:1, :] + 0.5) * es                      # anchor centers
    y_c = (gxy_ref[1:2, :] + 0.5) * es

    # ---- in-box / in-center tests via min-of-deltas (fewer VPU bool ops) ----
    b_l = x_c - (g_cx - 0.5 * g_w)
    b_r = (g_cx + 0.5 * g_w) - x_c
    b_t = y_c - (g_cy - 0.5 * g_h)
    b_b = (g_cy + 0.5 * g_h) - y_c
    in_boxes = jnp.minimum(jnp.minimum(b_l, b_r), jnp.minimum(b_t, b_b)) > 0.0

    r = 2.5
    c_l = x_c - (g_cx - r * es)
    c_r = (g_cx + r * es) - x_c
    c_t = y_c - (g_cy - r * es)
    c_b = (g_cy + r * es) - y_c
    in_centers = jnp.minimum(jnp.minimum(c_l, c_r), jnp.minimum(c_t, c_b)) > 0.0

    vmask = valid_ref[...] > 0.0                            # (G, 1) valid GTs
    amask = av_ref[...] > 0.0                               # (1, A) real anchors
    cand = (in_boxes | in_centers) & vmask & amask          # (G, A)
    fg_f = (jnp.sum(cand.astype(jnp.float32), axis=0, keepdims=True)
            > 0.0).astype(jnp.float32)                      # (1, A)
    in_both = (in_boxes & in_centers).astype(jnp.float32)

    # ---- pairwise IoU (cxcywh, matches bboxes_iou(..., xyxy=False)) --------
    dec = dec_ref[...]                                      # (5+C, A)
    p_cx = dec[0:1, :]
    p_cy = dec[1:2, :]
    p_w = dec[2:3, :]
    p_h = dec[3:4, :]
    tl_x = jnp.maximum(g_cx - 0.5 * g_w, p_cx - 0.5 * p_w)
    br_x = jnp.minimum(g_cx + 0.5 * g_w, p_cx + 0.5 * p_w)
    tl_y = jnp.maximum(g_cy - 0.5 * g_h, p_cy - 0.5 * p_h)
    br_y = jnp.minimum(g_cy + 0.5 * g_h, p_cy + 0.5 * p_h)
    en = ((tl_x < br_x) & (tl_y < br_y)).astype(jnp.float32)
    area_i = (br_x - tl_x) * (br_y - tl_y) * en
    iou = area_i / (g_w * g_h + p_w * p_h - area_i)         # no eps, like reference
    iou_cost = -jnp.log(iou + 1e-8)

    # ---- pairwise class BCE cost: single matmul, EUP-lean log path ---------
    #   log p     = 0.5*(log_sigmoid(cls) + log_sigmoid(obj))      (p = sqrt(.*.))
    #   BCE sum_c = -(t @ (logp - log1mp) + sum_c log1mp)
    obj_lsg = _log_sigmoid(dec[4:5, :])                     # (1, A)
    cls_lsg = _log_sigmoid(dec[5:, :])                      # (C, A)
    lp = 0.5 * (cls_lsg + obj_lsg)
    p = jnp.exp(lp)
    logp = jnp.maximum(lp, -100.0)                          # torch BCE clamps log
    log1mp = jnp.maximum(jnp.log(1.0 - p), -100.0)
    t = onehot_ref[...]                                     # (G, C) one-hot
    cls_cost = -(jnp.dot(t, logp - log1mp, preferred_element_type=jnp.float32)
                 + jnp.sum(log1mp, axis=0, keepdims=True))

    valid_f = vmask.astype(jnp.float32)
    av_f = amask.astype(jnp.float32)
    cost = (cls_cost + 3.0 * iou_cost
            + 100000.0 * (1.0 - in_both)
            + _BIG * (1.0 - fg_f)
            + _BIG * (1.0 - valid_f)
            + _BIG * (1.0 - av_f))
    cost_ref[...] = cost
    iou_ref[...] = iou * fg_f * valid_f


def _cost(gt_boxes, gt_onehot, valid, gxy, es, av, dec):
    B, G, _ = gt_boxes.shape
    C = gt_onehot.shape[2]
    _, n_ch, A = dec.shape
    return pl.pallas_call(
        _cost_kernel,
        out_shape=(jax.ShapeDtypeStruct((B, G, A), jnp.float32),
                   jax.ShapeDtypeStruct((B, G, A), jnp.float32)),
        grid=(B,),
        in_specs=[
            pl.BlockSpec((None, G, 4), lambda b: (b, 0, 0)),
            pl.BlockSpec((None, G, C), lambda b: (b, 0, 0)),
            pl.BlockSpec((None, G, 1), lambda b: (b, 0, 0)),
            pl.BlockSpec((2, A), lambda b: (0, 0)),          # resident grid table
            pl.BlockSpec((1, A), lambda b: (0, 0)),          # resident strides
            pl.BlockSpec((1, A), lambda b: (0, 0)),          # resident anchor-valid
            pl.BlockSpec((None, n_ch, A), lambda b: (b, 0, 0)),
        ],
        out_specs=(pl.BlockSpec((None, G, A), lambda b: (b, 0, 0)),
                   pl.BlockSpec((None, G, A), lambda b: (b, 0, 0))),
        compiler_params=pltpu.CompilerParams(dimension_semantics=("parallel",)),
        # TODO(synk): at real YOLOX shapes (C=80, A~8448, G~120) tile A and set
        # vmem_limit_bytes to respect v7x's smaller VMEM.
    )(gt_boxes, gt_onehot, valid, gxy, es, av, dec)


# ----------------------------------------------------------------------------
# Kernel 3: final masked loss reductions, grid=(B,), lane-dense layouts
# ----------------------------------------------------------------------------
def _loss_kernel(dec_ref, rt_ref, ot_ref, ct_ref, fg_ref, av_ref, out_ref):
    dec = dec_ref[...]                                      # (5+C, A)
    bp_cx = dec[0:1, :]
    bp_cy = dec[1:2, :]
    bp_w = dec[2:3, :]
    bp_h = dec[3:4, :]
    rt = rt_ref[...]                                        # (4, A) matched gt
    rt_cx = rt[0:1, :]
    rt_cy = rt[1:2, :]
    rt_w = rt[2:3, :]
    rt_h = rt[3:4, :]
    fg = fg_ref[...]                                        # (1, A)
    av = av_ref[...]                                        # (1, A) real anchors

    tl_x = jnp.maximum(bp_cx - 0.5 * bp_w, rt_cx - 0.5 * rt_w)
    br_x = jnp.minimum(bp_cx + 0.5 * bp_w, rt_cx + 0.5 * rt_w)
    tl_y = jnp.maximum(bp_cy - 0.5 * bp_h, rt_cy - 0.5 * rt_h)
    br_y = jnp.minimum(bp_cy + 0.5 * bp_h, rt_cy + 0.5 * rt_h)
    en = ((tl_x < br_x) & (tl_y < br_y)).astype(jnp.float32)
    area_i = (br_x - tl_x) * (br_y - tl_y) * en
    iou = area_i / (bp_w * bp_h + rt_w * rt_h - area_i + 1e-16)
    iou_sum = jnp.sum((1.0 - iou * iou) * fg, keepdims=True)   # IOUloss('iou')

    def bce_logits(x, z):
        return jnp.maximum(x, 0.0) - x * z + jnp.log(1.0 + jnp.exp(-jnp.abs(x)))

    obj_sum = jnp.sum(bce_logits(dec[4:5, :], ot_ref[...]) * av, keepdims=True)
    cls_sum = jnp.sum(bce_logits(dec[5:, :], ct_ref[...]) * fg, keepdims=True)

    lane = jax.lax.broadcasted_iota(jnp.int32, (1, 128), 1)
    out_ref[...] = (jnp.where(lane == 0, iou_sum, 0.0)
                    + jnp.where(lane == 1, obj_sum, 0.0)
                    + jnp.where(lane == 2, cls_sum, 0.0))


def _final_losses(dec, reg_t, obj_t, cls_t, fg, av):
    B, n_ch, A = dec.shape
    C = cls_t.shape[1]
    part = pl.pallas_call(
        _loss_kernel,
        out_shape=jax.ShapeDtypeStruct((B, 1, 128), jnp.float32),
        grid=(B,),
        in_specs=[
            pl.BlockSpec((None, n_ch, A), lambda b: (b, 0, 0)),
            pl.BlockSpec((None, 4, A), lambda b: (b, 0, 0)),
            pl.BlockSpec((None, 1, A), lambda b: (b, 0, 0)),
            pl.BlockSpec((None, C, A), lambda b: (b, 0, 0)),
            pl.BlockSpec((None, 1, A), lambda b: (b, 0, 0)),
            pl.BlockSpec((1, A), lambda b: (0, 0)),
        ],
        out_specs=pl.BlockSpec((None, 1, 128), lambda b: (b, 0, 0)),
        compiler_params=pltpu.CompilerParams(dimension_semantics=("parallel",)),
    )(dec, reg_t, obj_t, cls_t, fg, av)
    sums = jnp.sum(part, axis=0)[0]                          # (128,)
    return sums[0], sums[1], sums[2]


# ----------------------------------------------------------------------------
# YOLOX loss forward (glue in JAX, hot paths in Pallas)
# ----------------------------------------------------------------------------
class YOLOXLossPallas:
    def __init__(self, label_name, strides=(8, 16, 32)):
        self.num_classes = len(label_name)
        self.strides = list(strides)
        self.n_anchors = 1

    def __call__(self, preds, targets):
        C = self.num_classes
        B, n_ch = preds[0].shape[0], preds[0].shape[1]

        # --- build feature-major preds + per-anchor grid/stride tables -----
        pred_fm, gx, gy, es = [], [], [], []
        for stride, p in zip(self.strides, preds):
            _, _, H, W = p.shape
            pred_fm.append(p.reshape(B, n_ch, H * W))        # NCHW -> (B, C, HW)
            yv, xv = jnp.meshgrid(jnp.arange(H, dtype=jnp.float32),
                                  jnp.arange(W, dtype=jnp.float32), indexing="ij")
            gx.append(xv.reshape(-1))
            gy.append(yv.reshape(-1))
            es.append(jnp.full((H * W,), float(stride), jnp.float32))
        pred_fm = jnp.concatenate(pred_fm, axis=2)           # (B, 5+C, A)
        gx = jnp.concatenate(gx)
        gy = jnp.concatenate(gy)
        es = jnp.concatenate(es)

        A = pred_fm.shape[2]
        A_pad = max(128, ((A + 127) // 128) * 128)           # lane-dense anchor dim
        pad = A_pad - A
        pred_fm = jnp.pad(pred_fm, ((0, 0), (0, 0), (0, pad)))
        gxy = jnp.stack([jnp.pad(gx, (0, pad), constant_values=-1e4),
                         jnp.pad(gy, (0, pad), constant_values=-1e4)], axis=0)
        es2 = jnp.pad(es, (0, pad), constant_values=1.0)[None, :]
        av2 = jnp.pad(jnp.ones((A,), jnp.float32), (0, pad))[None, :]

        # --- kernel 1: fused decode over all levels + batch -----------------
        dec = _decode(pred_fm, gxy, es2)                     # (B, 5+C, A_pad)

        # --- GT prep ---------------------------------------------------------
        G = targets.shape[1]
        valid = (targets.sum(axis=2) > 0).astype(jnp.float32)[..., None]  # (B,G,1)
        gt_classes = targets[:, :, 0]
        gt_boxes = targets[:, :, 1:5]
        gt_onehot = jax.nn.one_hot(gt_classes.astype(jnp.int32), C, dtype=jnp.float32)
        nlabel = (targets.sum(axis=2) > 0).sum(axis=1)

        # --- kernel 2: batched SimOTA pairwise cost / IoU --------------------
        cost, ious = _cost(gt_boxes, gt_onehot, valid, gxy, es2, av2, dec)

        # --- dynamic-k matching (batched JAX glue) ---------------------------
        # TODO(synk): per-GT variable-k top-k + boolean fancy indexing has no
        # clean Pallas equivalent; emulated with fixed-shape masking.
        n_cand = min(10, A_pad)
        topk_ious, _ = jax.lax.top_k(ious, n_cand)
        dynamic_ks = jnp.maximum(jnp.sum(topk_ious, axis=-1).astype(jnp.int32), 1)
        ranks = jnp.argsort(jnp.argsort(cost, axis=-1), axis=-1)
        matching = ((ranks < dynamic_ks[..., None]) & (valid > 0)).astype(jnp.float32)

        anchor_matching = matching.sum(axis=1)               # (B, A_pad)
        conflict = anchor_matching > 1.0
        cmin_idx = jnp.argmin(cost, axis=1)                  # (B, A_pad)
        one_min = jnp.transpose(jax.nn.one_hot(cmin_idx, G, dtype=jnp.float32),
                                (0, 2, 1))                   # (B, G, A_pad)
        matching = jnp.where(conflict[:, None, :], one_min, matching)

        fg_final = matching.sum(axis=1) > 0.0                # (B, A_pad)
        num_fg_total = jnp.sum(fg_final.astype(jnp.float32))
        matched_inds = jnp.argmax(matching, axis=1)          # (B, A_pad)
        pred_ious = jnp.sum(matching * ious, axis=1)         # (B, A_pad)

        matched_cls = jnp.take_along_axis(gt_classes, matched_inds, axis=1)
        cls_t = jnp.transpose(
            jax.nn.one_hot(matched_cls.astype(jnp.int32), C, dtype=jnp.float32)
            * pred_ious[..., None], (0, 2, 1))               # (B, C, A_pad)
        reg_t = jnp.transpose(
            jnp.take_along_axis(
                gt_boxes,
                jnp.broadcast_to(matched_inds[..., None], (B, A_pad, 4)),
                axis=1), (0, 2, 1))                          # (B, 4, A_pad)
        fg = fg_final.astype(jnp.float32)[:, None, :]        # (B, 1, A_pad)
        obj_t = fg

        # --- kernel 3: final masked reductions -------------------------------
        iou_sum, obj_sum, cls_sum = _final_losses(dec, reg_t, obj_t, cls_t, fg, av2)

        num_fg = jnp.maximum(num_fg_total, 1.0)
        num_gts = jnp.maximum(nlabel.sum().astype(jnp.float32), 1.0)
        reg_weight = 5.0
        loss_iou = reg_weight * iou_sum / num_fg
        loss_obj = obj_sum / num_fg
        loss_cls = cls_sum / num_fg
        total = loss_iou + loss_obj + loss_cls

        return {"loss": total, "conf_loss": loss_obj, "cls_loss": loss_cls,
                "iou_loss": loss_iou, "num_fg": num_fg / num_gts}


# ----------------------------------------------------------------------------
if __name__ == "__main__":
    key = jax.random.PRNGKey(0)
    label_name = ["car", "person", "dog"]          # num_classes = 3
    strides = [8, 16, 32]
    B, img = 2, 64
    C = len(label_name)
    n_ch = 5 + C                                   # 4 box + 1 obj + C cls

    keys = jax.random.split(key, len(strides))
    preds = []
    for i, s in enumerate(strides):
        H = W = img // s
        preds.append(0.5 * jax.random.normal(keys[i], (B, n_ch, H, W), jnp.float32))

    max_objs = 8
    targets = jnp.zeros((B, max_objs, 5), jnp.float32)
    gts0 = jnp.array([[0.0, 16.0, 16.0, 12.0, 10.0],
                      [1.0, 40.0, 24.0, 20.0, 16.0],
                      [2.0, 50.0, 50.0, 14.0, 18.0]], jnp.float32)
    gts1 = jnp.array([[2.0, 10.0, 12.0, 8.0, 8.0],
                      [1.0, 30.0, 34.0, 16.0, 12.0],
                      [0.0, 44.0, 20.0, 10.0, 14.0],
                      [2.0, 56.0, 52.0, 12.0, 12.0],
                      [0.0, 20.0, 48.0, 18.0, 10.0]], jnp.float32)
    targets = targets.at[0, :3].set(gts0)
    targets = targets.at[1, :5].set(gts1)

    loss_fn = YOLOXLossPallas(label_name, strides=strides)
    out = jax.jit(lambda ps, t: loss_fn(ps, t))(preds, targets)
    out = jax.block_until_ready(out)
    print("KERNEL_OK")
</pallas_src>

<mosaic_0001>
module attributes {stable_mosaic.version = 11 : i64} {
  func.func @_cost_kernel(%arg0: i32, %arg1: memref<1x8x4xf32, #tpu.memory_space<vmem>>, %arg2: memref<1x8x3xf32, #tpu.memory_space<vmem>>, %arg3: memref<1x8x1xf32, #tpu.memory_space<vmem>>, %arg4: memref<2x128xf32, #tpu.memory_space<vmem>>, %arg5: memref<1x128xf32, #tpu.memory_space<vmem>>, %arg6: memref<1x128xf32, #tpu.memory_space<vmem>>, %arg7: memref<1x8x128xf32, #tpu.memory_space<vmem>>, %arg8: memref<1x8x128xf32, #tpu.memory_space<vmem>>, %arg9: memref<1x8x128xf32, #tpu.memory_space<vmem>>) attributes {dimension_semantics = [#tpu.dimension_semantics<parallel>], iteration_bounds = array<i64: 2>, scalar_prefetch = 0 : i64, scratch_operands = 0 : i64, tpu.core_type = #tpu.core_type<tc>, window_params = [{transform_indices = @transform_0, window_bounds = array<i64: 1, 8, 4>}, {transform_indices = @transform_1, window_bounds = array<i64: 1, 8, 3>}, {transform_indices = @transform_2, window_bounds = array<i64: 1, 8, 1>}, {pipeline_mode = #tpu.pipeline_mode<synchronous>, transform_indices = @transform_3, window_bounds = array<i64: 2, 128>}, {pipeline_mode = #tpu.pipeline_mode<synchronous>, transform_indices = @transform_4, window_bounds = array<i64: 1, 128>}, {pipeline_mode = #tpu.pipeline_mode<synchronous>, transform_indices = @transform_5, window_bounds = array<i64: 1, 128>}, {transform_indices = @transform_6, window_bounds = array<i64: 1, 8, 128>}, {transform_indices = @transform_7, window_bounds = array<i64: 1, 8, 128>}, {transform_indices = @transform_8, window_bounds = array<i64: 1, 8, 128>}]} {
    %c0 = arith.constant 0 : index
    %c0_0 = arith.constant 0 : index
    %c0_1 = arith.constant 0 : index
    %0 = vector.load %arg1[%c0, %c0_0, %c0_1] : memref<1x8x4xf32, #tpu.memory_space<vmem>>, vector<1x8x4xf32>
    %1 = vector.shape_cast %0 : vector<1x8x4xf32> to vector<8x4xf32>
    %2 = vector.extract_strided_slice %1 {offsets = [0, 0], sizes = [8, 1], strides = [1, 1]} : vector<8x4xf32> to vector<8x1xf32>
    %3 = vector.extract_strided_slice %1 {offsets = [0, 1], sizes = [8, 1], strides = [1, 1]} : vector<8x4xf32> to vector<8x1xf32>
    %4 = vector.extract_strided_slice %1 {offsets = [0, 2], sizes = [8, 1], strides = [1, 1]} : vector<8x4xf32> to vector<8x1xf32>
    %5 = vector.extract_strided_slice %1 {offsets = [0, 3], sizes = [8, 1], strides = [1, 1]} : vector<8x4xf32> to vector<8x1xf32>
    %c0_2 = arith.constant 0 : index
    %c0_3 = arith.constant 0 : index
    %6 = vector.load %arg5[%c0_2, %c0_3] : memref<1x128xf32, #tpu.memory_space<vmem>>, vector<1x128xf32>
    %c0_4 = arith.constant 0 : index
    %c0_5 = arith.constant 0 : index
    %7 = vector.load %arg4[%c0_4, %c0_5] : memref<2x128xf32, #tpu.memory_space<vmem>>, vector<1x128xf32>
    %cst = arith.constant 5.000000e-01 : f32
    %8 = vector.broadcast %cst : f32 to vector<1x128xf32>
    %9 = arith.addf %7, %8 : vector<1x128xf32>
    %10 = arith.mulf %9, %6 : vector<1x128xf32>
    %c1 = arith.constant 1 : index
    %c0_6 = arith.constant 0 : index
    %11 = vector.load %arg4[%c1, %c0_6] : memref<2x128xf32, #tpu.memory_space<vmem>>, vector<1x128xf32>
    %cst_7 = arith.constant 5.000000e-01 : f32
    %12 = vector.broadcast %cst_7 : f32 to vector<1x128xf32>
    %13 = arith.addf %11, %12 : vector<1x128xf32>
    %14 = arith.mulf %13, %6 : vector<1x128xf32>
    %cst_8 = arith.constant 5.000000e-01 : f32
    %15 = vector.broadcast %cst_8 : f32 to vector<8x1xf32>
    %16 = arith.mulf %15, %4 : vector<8x1xf32>
    %17 = arith.subf %2, %16 : vector<8x1xf32>
    %18 = vector.broadcast %10 : vector<1x128xf32> to vector<8x128xf32>
    %19 = vector.broadcast %17 : vector<8x1xf32> to vector<8x128xf32>
    %20 = arith.subf %18, %19 : vector<8x128xf32>
    %cst_9 = arith.constant 5.000000e-01 : f32
    %21 = vector.broadcast %cst_9 : f32 to vector<8x1xf32>
    %22 = arith.mulf %21, %4 : vector<8x1xf32>
    %23 = arith.addf %2, %22 : vector<8x1xf32>
    %24 = vector.broadcast %23 : vector<8x1xf32> to vector<8x128xf32>
    %25 = vector.broadcast %10 : vector<1x128xf32> to vector<8x128xf32>
    %26 = arith.subf %24, %25 : vector<8x128xf32>
    %cst_10 = arith.constant 5.000000e-01 : f32
    %27 = vector.broadcast %cst_10 : f32 to vector<8x1xf32>
    %28 = arith.mulf %27, %5 : vector<8x1xf32>
    %29 = arith.subf %3, %28 : vector<8x1xf32>
    %30 = vector.broadcast %14 : vector<1x128xf32> to vector<8x128xf32>
    %31 = vector.broadcast %29 : vector<8x1xf32> to vector<8x128xf32>
    %32 = arith.subf %30, %31 : vector<8x128xf32>
    %cst_11 = arith.constant 5.000000e-01 : f32
    %33 = vector.broadcast %cst_11 : f32 to vector<8x1xf32>
    %34 = arith.mulf %33, %5 : vector<8x1xf32>
    %35 = arith.addf %3, %34 : vector<8x1xf32>
    %36 = vector.broadcast %35 : vector<8x1xf32> to vector<8x128xf32>
    %37 = vector.broadcast %14 : vector<1x128xf32> to vector<8x128xf32>
    %38 = arith.subf %36, %37 : vector<8x128xf32>
    %39 = arith.minimumf %20, %26 : vector<8x128xf32>
    %40 = arith.minimumf %32, %38 : vector<8x128xf32>
    %41 = arith.minimumf %39, %40 : vector<8x128xf32>
    %cst_12 = arith.constant 0.000000e+00 : f32
    %42 = vector.broadcast %cst_12 : f32 to vector<8x128xf32>
    %43 = arith.cmpf ogt, %41, %42 : vector<8x128xf32>
    %cst_13 = arith.constant 2.500000e+00 : f32
    %44 = vector.broadcast %cst_13 : f32 to vector<1x128xf32>
    %45 = arith.mulf %44, %6 : vector<1x128xf32>
    %46 = vector.broadcast %2 : vector<8x1xf32> to vector<8x128xf32>
    %47 = vector.broadcast %45 : vector<1x128xf32> to vector<8x128xf32>
    %48 = arith.subf %46, %47 : vector<8x128xf32>
    %49 = vector.broadcast %10 : vector<1x128xf32> to vector<8x128xf32>
    %50 = arith.subf %49, %48 : vector<8x128xf32>
    %cst_14 = arith.constant 2.500000e+00 : f32
    %51 = vector.broadcast %cst_14 : f32 to vector<1x128xf32>
    %52 = arith.mulf %51, %6 : vector<1x128xf32>
    %53 = vector.broadcast %2 : vector<8x1xf32> to vector<8x128xf32>
    %54 = vector.broadcast %52 : vector<1x128xf32> to vector<8x128xf32>
    %55 = arith.addf %53, %54 : vector<8x128xf32>
    %56 = vector.broadcast %10 : vector<1x128xf32> to vector<8x128xf32>
    %57 = arith.subf %55, %56 : vector<8x128xf32>
    %cst_15 = arith.constant 2.500000e+00 : f32
    %58 = vector.broadcast %cst_15 : f32 to vector<1x128xf32>
    %59 = arith.mulf %58, %6 : vector<1x128xf32>
    %60 = vector.broadcast %3 : vector<8x1xf32> to vector<8x128xf32>
    %61 = vector.broadcast %59 : vector<1x128xf32> to vector<8x128xf32>
    %62 = arith.subf %60, %61 : vector<8x128xf32>
    %63 = vector.broadcast %14 : vector<1x128xf32> to vector<8x128xf32>
    %64 = arith.subf %63, %62 : vector<8x128xf32>
    %cst_16 = arith.constant 2.500000e+00 : f32
    %65 = vector.broadcast %cst_16 : f32 to vector<1x128xf32>
    %66 = arith.mulf %65, %6 : vector<1x128xf32>
    %67 = vector.broadcast %3 : vector<8x1xf32> to vector<8x128xf32>
    %68 = vector.broadcast %66 : vector<1x128xf32> to vector<8x128xf32>
    %69 = arith.addf %67, %68 : vector<8x128xf32>
    %70 = vector.broadcast %14 : vector<1x128xf32> to vector<8x128xf32>
    %71 = arith.subf %69, %70 : vector<8x128xf32>
    %72 = arith.minimumf %50, %57 : vector<8x128xf32>
    %73 = arith.minimumf %64, %71 : vector<8x128xf32>
    %74 = arith.minimumf %72, %73 : vector<8x128xf32>
    %cst_17 = arith.constant 0.000000e+00 : f32
    %75 = vector.broadcast %cst_17 : f32 to vector<8x128xf32>
    %76 = arith.cmpf ogt, %74, %75 : vector<8x128xf32>
    %c0_18 = arith.constant 0 : index
    %c0_19 = arith.constant 0 : index
    %c0_20 = arith.constant 0 : index
    %77 = vector.load %arg3[%c0_18, %c0_19, %c0_20] : memref<1x8x1xf32, #tpu.memory_space<vmem>>, vector<1x8x1xf32>
    %78 = vector.shape_cast %77 : vector<1x8x1xf32> to vector<8x1xf32>
    %cst_21 = arith.constant 0.000000e+00 : f32
    %79 = vector.broadcast %cst_21 : f32 to vector<8x1xf32>
    %80 = arith.cmpf ogt, %78, %79 : vector<8x1xf32>
    %c0_22 = arith.constant 0 : index
    %c0_23 = arith.constant 0 : index
    %81 = vector.load %arg6[%c0_22, %c0_23] : memref<1x128xf32, #tpu.memory_space<vmem>>, vector<1x128xf32>
    %cst_24 = arith.constant 0.000000e+00 : f32
    %82 = vector.broadcast %cst_24 : f32 to vector<1x128xf32>
    %83 = arith.cmpf ogt, %81, %82 : vector<1x128xf32>
    %84 = arith.ori %43, %76 : vector<8x128xi1>
    %85 = vector.broadcast %80 : vector<8x1xi1> to vector<8x128xi1>
    %86 = arith.andi %84, %85 : vector<8x128xi1>
    %87 = vector.broadcast %83 : vector<1x128xi1> to vector<8x128xi1>
    %88 = arith.andi %86, %87 : vector<8x128xi1>
    %89 = arith.extui %88 : vector<8x128xi1> to vector<8x128xi32>
    %90 = arith.sitofp %89 : vector<8x128xi32> to vector<8x128xf32>
    %cst_25 = arith.constant dense<0.000000e+00> : vector<128xf32>
    %91 = vector.multi_reduction <add>, %90, %cst_25 [0] : vector<8x128xf32> to vector<128xf32>
    %92 = vector.shape_cast %91 : vector<128xf32> to vector<1x128xf32>
    %cst_26 = arith.constant 0.000000e+00 : f32
    %93 = vector.broadcast %cst_26 : f32 to vector<1x128xf32>
    %94 = arith.cmpf ogt, %92, %93 : vector<1x128xf32>
    %95 = arith.extui %94 : vector<1x128xi1> to vector<1x128xi32>
    %96 = arith.sitofp %95 : vector<1x128xi32> to vector<1x128xf32>
    %97 = arith.andi %43, %76 : vector<8x128xi1>
    %98 = arith.extui %97 : vector<8x128xi1> to vector<8x128xi32>
    %99 = arith.sitofp %98 : vector<8x128xi32> to vector<8x128xf32>
    %c0_27 = arith.constant 0 : index
    %c0_28 = arith.constant 0 : index
    %c0_29 = arith.constant 0 : index
    %100 = vector.load %arg7[%c0_27, %c0_28, %c0_29] : memref<1x8x128xf32, #tpu.memory_space<vmem>>, vector<1x8x128xf32>
    %101 = vector.shape_cast %100 : vector<1x8x128xf32> to vector<8x128xf32>
    %102 = vector.extract_strided_slice %101 {offsets = [0, 0], sizes = [1, 128], strides = [1, 1]} : vector<8x128xf32> to vector<1x128xf32>
    %103 = vector.extract_strided_slice %101 {offsets = [1, 0], sizes = [1, 128], strides = [1, 1]} : vector<8x128xf32> to vector<1x128xf32>
    %104 = vector.extract_strided_slice %101 {offsets = [2, 0], sizes = [1, 128], strides = [1, 1]} : vector<8x128xf32> to vector<1x128xf32>
    %105 = vector.extract_strided_slice %101 {offsets = [3, 0], sizes = [1, 128], strides = [1, 1]} : vector<8x128xf32> to vector<1x128xf32>
    %cst_30 = arith.constant 5.000000e-01 : f32
    %106 = vector.broadcast %cst_30 : f32 to vector<8x1xf32>
    %107 = arith.mulf %106, %4 : vector<8x1xf32>
    %108 = arith.subf %2, %107 : vector<8x1xf32>
    %cst_31 = arith.constant 5.000000e-01 : f32
    %109 = vector.broadcast %cst_31 : f32 to vector<1x128xf32>
    %110 = arith.mulf %109, %104 : vector<1x128xf32>
    %111 = arith.subf %102, %110 : vector<1x128xf32>
    %112 = vector.broadcast %108 : vector<8x1xf32> to vector<8x128xf32>
    %113 = vector.broadcast %111 : vector<1x128xf32> to vector<8x128xf32>
    %114 = arith.maximumf %112, %113 : vector<8x128xf32>
    %cst_32 = arith.constant 5.000000e-01 : f32
    %115 = vector.broadcast %cst_32 : f32 to vector<8x1xf32>
    %116 = arith.mulf %115, %4 : vector<8x1xf32>
    %117 = arith.addf %2, %116 : vector<8x1xf32>
    %cst_33 = arith.constant 5.000000e-01 : f32
    %118 = vector.broadcast %cst_33 : f32 to vector<1x128xf32>
    %119 = arith.mulf %118, %104 : vector<1x128xf32>
    %120 = arith.addf %102, %119 : vector<1x128xf32>
    %121 = vector.broadcast %117 : vector<8x1xf32> to vector<8x128xf32>
    %122 = vector.broadcast %120 : vector<1x128xf32> to vector<8x128xf32>
    %123 = arith.minimumf %121, %122 : vector<8x128xf32>
    %cst_34 = arith.constant 5.000000e-01 : f32
    %124 = vector.broadcast %cst_34 : f32 to vector<8x1xf32>
    %125 = arith.mulf %124, %5 : vector<8x1xf32>
    %126 = arith.subf %3, %125 : vector<8x1xf32>
    %cst_35 = arith.constant 5.000000e-01 : f32
    %127 = vector.broadcast %cst_35 : f32 to vector<1x128xf32>
    %128 = arith.mulf %127, %105 : vector<1x128xf32>
    %129 = arith.subf %103, %128 : vector<1x128xf32>
    %130 = vector.broadcast %126 : vector<8x1xf32> to vector<8x128xf32>
    %131 = vector.broadcast %129 : vector<1x128xf32> to vector<8x128xf32>
    %132 = arith.maximumf %130, %131 : vector<8x128xf32>
    %cst_36 = arith.constant 5.000000e-01 : f32
    %133 = vector.broadcast %cst_36 : f32 to vector<8x1xf32>
    %134 = arith.mulf %133, %5 : vector<8x1xf32>
    %135 = arith.addf %3, %134 : vector<8x1xf32>
    %cst_37 = arith.constant 5.000000e-01 : f32
    %136 = vector.broadcast %cst_37 : f32 to vector<1x128xf32>
    %137 = arith.mulf %136, %105 : vector<1x128xf32>
    %138 = arith.addf %103, %137 : vector<1x128xf32>
    %139 = vector.broadcast %135 : vector<8x1xf32> to vector<8x128xf32>
    %140 = vector.broadcast %138 : vector<1x128xf32> to vector<8x128xf32>
    %141 = arith.minimumf %139, %140 : vector<8x128xf32>
    %142 = arith.cmpf olt, %114, %123 : vector<8x128xf32>
    %143 = arith.cmpf olt, %132, %141 : vector<8x128xf32>
    %144 = arith.andi %142, %143 : vector<8x128xi1>
    %145 = arith.extui %144 : vector<8x128xi1> to vector<8x128xi32>
    %146 = arith.sitofp %145 : vector<8x128xi32> to vector<8x128xf32>
    %147 = arith.subf %123, %114 : vector<8x128xf32>
    %148 = arith.subf %141, %132 : vector<8x128xf32>
    %149 = arith.mulf %147, %148 : vector<8x128xf32>
    %150 = arith.mulf %149, %146 : vector<8x128xf32>
    %151 = arith.mulf %4, %5 : vector<8x1xf32>
    %152 = arith.mulf %104, %105 : vector<1x128xf32>
    %153 = vector.broadcast %151 : vector<8x1xf32> to vector<8x128xf32>
    %154 = vector.broadcast %152 : vector<1x128xf32> to vector<8x128xf32>
    %155 = arith.addf %153, %154 : vector<8x128xf32>
    %156 = arith.subf %155, %150 : vector<8x128xf32>
    %157 = arith.divf %150, %156 : vector<8x128xf32>
    %cst_38 = arith.constant 9.99999993E-9 : f32
    %158 = vector.broadcast %cst_38 : f32 to vector<8x128xf32>
    %159 = arith.addf %157, %158 : vector<8x128xf32>
    %160 = math.log %159 : vector<8x128xf32>
    %cst_39 = arith.constant 0.000000e+00 : f32
    %161 = vector.broadcast %cst_39 : f32 to vector<8x128xf32>
    %162 = arith.subf %161, %160 : vector<8x128xf32>
    %163 = vector.extract_strided_slice %101 {offsets = [4, 0], sizes = [1, 128], strides = [1, 1]} : vector<8x128xf32> to vector<1x128xf32>
    %cst_40 = arith.constant 0.000000e+00 : f32
    %164 = vector.broadcast %cst_40 : f32 to vector<1x128xf32>
    %165 = arith.minimumf %163, %164 : vector<1x128xf32>
    %166 = math.absf %163 : vector<1x128xf32>
    %cst_41 = arith.constant 0.000000e+00 : f32
    %167 = vector.broadcast %cst_41 : f32 to vector<1x128xf32>
    %168 = arith.subf %167, %166 : vector<1x128xf32>
    %169 = math.exp %168 : vector<1x128xf32>
    %cst_42 = arith.constant 1.000000e+00 : f32
    %170 = vector.broadcast %cst_42 : f32 to vector<1x128xf32>
    %171 = arith.addf %170, %169 : vector<1x128xf32>
    %172 = math.log %171 : vector<1x128xf32>
    %173 = arith.subf %165, %172 : vector<1x128xf32>
    %174 = vector.extract_strided_slice %101 {offsets = [5, 0], sizes = [3, 128], strides = [1, 1]} : vector<8x128xf32> to vector<3x128xf32>
    %cst_43 = arith.constant 0.000000e+00 : f32
    %175 = vector.broadcast %cst_43 : f32 to vector<3x128xf32>
    %176 = arith.minimumf %174, %175 : vector<3x128xf32>
    %177 = math.absf %174 : vector<3x128xf32>
    %cst_44 = arith.constant 0.000000e+00 : f32
    %178 = vector.broadcast %cst_44 : f32 to vector<3x128xf32>
    %179 = arith.subf %178, %177 : vector<3x128xf32>
    %180 = math.exp %179 : vector<3x128xf32>
    %cst_45 = arith.constant 1.000000e+00 : f32
    %181 = vector.broadcast %cst_45 : f32 to vector<3x128xf32>
    %182 = arith.addf %181, %180 : vector<3x128xf32>
    %183 = math.log %182 : vector<3x128xf32>
    %184 = arith.subf %176, %183 : vector<3x128xf32>
    %185 = vector.broadcast %173 : vector<1x128xf32> to vector<3x128xf32>
    %186 = arith.addf %184, %185 : vector<3x128xf32>
    %cst_46 = arith.constant 5.000000e-01 : f32
    %187 = vector.broadcast %cst_46 : f32 to vector<3x128xf32>
    %188 = arith.mulf %187, %186 : vector<3x128xf32>
    %189 = math.exp %188 : vector<3x128xf32>
    %cst_47 = arith.constant -1.000000e+02 : f32
    %190 = vector.broadcast %cst_47 : f32 to vector<3x128xf32>
    %191 = arith.maximumf %188, %190 : vector<3x128xf32>
    %cst_48 = arith.constant 1.000000e+00 : f32
    %192 = vector.broadcast %cst_48 : f32 to vector<3x128xf32>
    %193 = arith.subf %192, %189 : vector<3x128xf32>
    %194 = math.log %193 : vector<3x128xf32>
    %cst_49 = arith.constant -1.000000e+02 : f32
    %195 = vector.broadcast %cst_49 : f32 to vector<3x128xf32>
    %196 = arith.maximumf %194, %195 : vector<3x128xf32>
    %c0_50 = arith.constant 0 : index
    %c0_51 = arith.constant 0 : index
    %c0_52 = arith.constant 0 : index
    %197 = vector.load %arg2[%c0_50, %c0_51, %c0_52] : memref<1x8x3xf32, #tpu.memory_space<vmem>>, vector<1x8x3xf32>
    %198 = vector.shape_cast %197 : vector<1x8x3xf32> to vector<8x3xf32>
    %199 = arith.subf %191, %196 : vector<3x128xf32>
    %cst_53 = arith.constant dense<0.000000e+00> : vector<8x128xf32>
    %200 = tpu.matmul %198, %199, %cst_53 {dimension_numbers = #tpu.dot_dimension_numbers<[1], [0], [0], [1], [0, 0, 1, 1], [], []>} : vector<8x3xf32>, vector<3x128xf32>, vector<8x128xf32> -> vector<8x128xf32>
    %cst_54 = arith.constant dense<0.000000e+00> : vector<128xf32>
    %201 = vector.multi_reduction <add>, %196, %cst_54 [0] : vector<3x128xf32> to vector<128xf32>
    %202 = vector.shape_cast %201 : vector<128xf32> to vector<1x128xf32>
    %203 = vector.broadcast %202 : vector<1x128xf32> to vector<8x128xf32>
    %204 = arith.addf %200, %203 : vector<8x128xf32>
    %cst_55 = arith.constant 0.000000e+00 : f32
    %205 = vector.broadcast %cst_55 : f32 to vector<8x128xf32>
    %206 = arith.subf %205, %204 : vector<8x128xf32>
    %207 = arith.extui %80 : vector<8x1xi1> to vector<8x1xi32>
    %208 = arith.sitofp %207 : vector<8x1xi32> to vector<8x1xf32>
    %209 = arith.extui %83 : vector<1x128xi1> to vector<1x128xi32>
    %210 = arith.sitofp %209 : vector<1x128xi32> to vector<1x128xf32>
    %cst_56 = arith.constant 3.000000e+00 : f32
    %211 = vector.broadcast %cst_56 : f32 to vector<8x128xf32>
    %212 = arith.mulf %211, %162 : vector<8x128xf32>
    %213 = arith.addf %206, %212 : vector<8x128xf32>
    %cst_57 = arith.constant 1.000000e+00 : f32
    %214 = vector.broadcast %cst_57 : f32 to vector<8x128xf32>
    %215 = arith.subf %214, %99 : vector<8x128xf32>
    %cst_58 = arith.constant 1.000000e+05 : f32
    %216 = vector.broadcast %cst_58 : f32 to vector<8x128xf32>
    %217 = arith.mulf %216, %215 : vector<8x128xf32>
    %218 = arith.addf %213, %217 : vector<8x128xf32>
    %cst_59 = arith.constant 1.000000e+00 : f32
    %219 = vector.broadcast %cst_59 : f32 to vector<1x128xf32>
    %220 = arith.subf %219, %96 : vector<1x128xf32>
    %cst_60 = arith.constant 1.000000e+09 : f32
    %221 = vector.broadcast %cst_60 : f32 to vector<1x128xf32>
    %222 = arith.mulf %221, %220 : vector<1x128xf32>
    %223 = vector.broadcast %222 : vector<1x128xf32> to vector<8x128xf32>
    %224 = arith.addf %218, %223 : vector<8x128xf32>
    %cst_61 = arith.constant 1.000000e+00 : f32
    %225 = vector.broadcast %cst_61 : f32 to vector<8x1xf32>
    %226 = arith.subf %225, %208 : vector<8x1xf32>
    %cst_62 = arith.constant 1.000000e+09 : f32
    %227 = vector.broadcast %cst_62 : f32 to vector<8x1xf32>
    %228 = arith.mulf %227, %226 : vector<8x1xf32>
    %229 = vector.broadcast %228 : vector<8x1xf32> to vector<8x128xf32>
    %230 = arith.addf %224, %229 : vector<8x128xf32>
    %cst_63 = arith.constant 1.000000e+00 : f32
    %231 = vector.broadcast %cst_63 : f32 to vector<1x128xf32>
    %232 = arith.subf %231, %210 : vector<1x128xf32>
    %cst_64 = arith.constant 1.000000e+09 : f32
    %233 = vector.broadcast %cst_64 : f32 to vector<1x128xf32>
    %234 = arith.mulf %233, %232 : vector<1x128xf32>
    %235 = vector.broadcast %234 : vector<1x128xf32> to vector<8x128xf32>
    %236 = arith.addf %230, %235 : vector<8x128xf32>
    %c0_65 = arith.constant 0 : index
    %c0_66 = arith.constant 0 : index
    %c0_67 = arith.constant 0 : index
    %237 = vector.load %arg8[%c0_65, %c0_66, %c0_67] : memref<1x8x128xf32, #tpu.memory_space<vmem>>, vector<1x8x128xf32>
    %238 = vector.shape_cast %237 : vector<1x8x128xf32> to vector<8x128xf32>
    %239 = vector.shape_cast %236 : vector<8x128xf32> to vector<1x8x128xf32>
    tpu.vector_store %arg8[%c0_65, %c0_66, %c0_67], %239 {strides = array<i32>} : memref<1x8x128xf32, #tpu.memory_space<vmem>>, vector<1x8x128xf32>,
    %240 = vector.broadcast %96 : vector<1x128xf32> to vector<8x128xf32>
    %241 = arith.mulf %157, %240 : vector<8x128xf32>
    %242 = vector.broadcast %208 : vector<8x1xf32> to vector<8x128xf32>
    %243 = arith.mulf %241, %242 : vector<8x128xf32>
    %c0_68 = arith.constant 0 : index
    %c0_69 = arith.constant 0 : index
    %c0_70 = arith.constant 0 : index
    %244 = vector.load %arg9[%c0_68, %c0_69, %c0_70] : memref<1x8x128xf32, #tpu.memory_space<vmem>>, vector<1x8x128xf32>
    %245 = vector.shape_cast %244 : vector<1x8x128xf32> to vector<8x128xf32>
    %246 = vector.shape_cast %243 : vector<8x128xf32> to vector<1x8x128xf32>
    tpu.vector_store %arg9[%c0_68, %c0_69, %c0_70], %246 {strides = array<i32>} : memref<1x8x128xf32, #tpu.memory_space<vmem>>, vector<1x8x128xf32>,
    return
  }
  func.func @transform_0(%arg0: i32) -> (i32, i32, i32) {
    %c0_i32 = arith.constant 0 : i32
    %c0_i32_0 = arith.constant 0 : i32
    %c0_i32_1 = arith.constant 0 : i32
    return %arg0, %c0_i32, %c0_i32_0 : i32, i32, i32
  }
  func.func @transform_1(%arg0: i32) -> (i32, i32, i32) {
    %c0_i32 = arith.constant 0 : i32
    %c0_i32_0 = arith.constant 0 : i32
    %c0_i32_1 = arith.constant 0 : i32
    return %arg0, %c0_i32, %c0_i32_0 : i32, i32, i32
  }
  func.func @transform_2(%arg0: i32) -> (i32, i32, i32) {
    %c0_i32 = arith.constant 0 : i32
    %c0_i32_0 = arith.constant 0 : i32
    %c0_i32_1 = arith.constant 0 : i32
    return %arg0, %c0_i32, %c0_i32_0 : i32, i32, i32
  }
  func.func @transform_3(%arg0: i32) -> (i32, i32) {
    %c0_i32 = arith.constant 0 : i32
    %c0_i32_0 = arith.constant 0 : i32
    %c0_i32_1 = arith.constant 0 : i32
    return %c0_i32, %c0_i32_0 : i32, i32
  }
  func.func @transform_4(%arg0: i32) -> (i32, i32) {
    %c0_i32 = arith.constant 0 : i32
    %c0_i32_0 = arith.constant 0 : i32
    %c0_i32_1 = arith.constant 0 : i32
    return %c0_i32, %c0_i32_0 : i32, i32
  }
  func.func @transform_5(%arg0: i32) -> (i32, i32) {
    %c0_i32 = arith.constant 0 : i32
    %c0_i32_0 = arith.constant 0 : i32
    %c0_i32_1 = arith.constant 0 : i32
    return %c0_i32, %c0_i32_0 : i32, i32
  }
  func.func @transform_6(%arg0: i32) -> (i32, i32, i32) {
    %c0_i32 = arith.constant 0 : i32
    %c0_i32_0 = arith.constant 0 : i32
    %c0_i32_1 = arith.constant 0 : i32
    return %arg0, %c0_i32, %c0_i32_0 : i32, i32, i32
  }
  func.func @transform_7(%arg0: i32) -> (i32, i32, i32) {
    %c0_i32 = arith.constant 0 : i32
    %c0_i32_0 = arith.constant 0 : i32
    %c0_i32_1 = arith.constant 0 : i32
    return %arg0, %c0_i32, %c0_i32_0 : i32, i32, i32
  }
  func.func @transform_8(%arg0: i32) -> (i32, i32, i32) {
    %c0_i32 = arith.constant 0 : i32
    %c0_i32_0 = arith.constant 0 : i32
    %c0_i32_1 = arith.constant 0 : i32
    return %arg0, %c0_i32, %c0_i32_0 : i32, i32, i32
  }
}

module attributes {stable_mosaic.version = 11 : i64} {
  func.func @_decode_kernel(%arg0: i32, %arg1: memref<1x8x128xf32, #tpu.memory_space<vmem>>, %arg2: memref<2x128xf32, #tpu.memory_space<vmem>>, %arg3: memref<1x128xf32, #tpu.memory_space<vmem>>, %arg4: memref<1x8x128xf32, #tpu.memory_space<vmem>>) attributes {dimension_semantics = [#tpu.dimension_semantics<parallel>], iteration_bounds = array<i64: 2>, scalar_prefetch = 0 : i64, scratch_operands = 0 : i64, tpu.core_type = #tpu.core_type<tc>, window_params = [{transform_indices = @transform_0, window_bounds = array<i64: 1, 8, 128>}, {pipeline_mode = #tpu.pipeline_mode<synchronous>, transform_indices = @transform_1, window_bounds = array<i64: 2, 128>}, {pipeline_mode = #tpu.pipeline_mode<synchronous>, transform_indices = @transform_2, window_bounds = array<i64: 1, 128>}, {transform_indices = @transform_3, window_bounds = array<i64: 1, 8, 128>}]} {
    %c0 = arith.constant 0 : index
    %c0_0 = arith.constant 0 : index
    %0 = vector.load %arg3[%c0, %c0_0] : memref<1x128xf32, #tpu.memory_space<vmem>>, vector<1x128xf32>
    %c0_1 = arith.constant 0 : index
    %c0_2 = arith.constant 0 : index
    %c0_3 = arith.constant 0 : index
    %1 = vector.load %arg1[%c0_1, %c0_2, %c0_3] : memref<1x8x128xf32, #tpu.memory_space<vmem>>, vector<1x2x128xf32>
    %2 = vector.shape_cast %1 : vector<1x2x128xf32> to vector<2x128xf32>
    %c0_4 = arith.constant 0 : index
    %c0_5 = arith.constant 0 : index
    %3 = vector.load %arg2[%c0_4, %c0_5] : memref<2x128xf32, #tpu.memory_space<vmem>>, vector<2x128xf32>
    %4 = arith.addf %2, %3 : vector<2x128xf32>
    %5 = vector.broadcast %0 : vector<1x128xf32> to vector<2x128xf32>
    %6 = arith.mulf %4, %5 : vector<2x128xf32>
    %c0_6 = arith.constant 0 : index
    %c0_7 = arith.constant 0 : index
    %c0_8 = arith.constant 0 : index
    %7 = vector.load %arg4[%c0_6, %c0_7, %c0_8] : memref<1x8x128xf32, #tpu.memory_space<vmem>>, vector<1x2x128xf32>
    %8 = vector.shape_cast %7 : vector<1x2x128xf32> to vector<2x128xf32>
    %9 = vector.shape_cast %6 : vector<2x128xf32> to vector<1x2x128xf32>
    tpu.vector_store %arg4[%c0_6, %c0_7, %c0_8], %9 {strides = array<i32>} : memref<1x8x128xf32, #tpu.memory_space<vmem>>, vector<1x2x128xf32>,
    %c0_9 = arith.constant 0 : index
    %c2 = arith.constant 2 : index
    %c0_10 = arith.constant 0 : index
    %10 = vector.load %arg1[%c0_9, %c2, %c0_10] : memref<1x8x128xf32, #tpu.memory_space<vmem>>, vector<1x2x128xf32>
    %11 = vector.shape_cast %10 : vector<1x2x128xf32> to vector<2x128xf32>
    %12 = math.exp %11 : vector<2x128xf32>
    %13 = vector.broadcast %0 : vector<1x128xf32> to vector<2x128xf32>
    %14 = arith.mulf %12, %13 : vector<2x128xf32>
    %c0_11 = arith.constant 0 : index
    %c2_12 = arith.constant 2 : index
    %c0_13 = arith.constant 0 : index
    %15 = vector.load %arg4[%c0_11, %c2_12, %c0_13] : memref<1x8x128xf32, #tpu.memory_space<vmem>>, vector<1x2x128xf32>
    %16 = vector.shape_cast %15 : vector<1x2x128xf32> to vector<2x128xf32>
    %17 = vector.shape_cast %14 : vector<2x128xf32> to vector<1x2x128xf32>
    tpu.vector_store %arg4[%c0_11, %c2_12, %c0_13], %17 {strides = array<i32>} : memref<1x8x128xf32, #tpu.memory_space<vmem>>, vector<1x2x128xf32>,
    %c0_14 = arith.constant 0 : index
    %c4 = arith.constant 4 : index
    %c0_15 = arith.constant 0 : index
    %18 = vector.load %arg1[%c0_14, %c4, %c0_15] : memref<1x8x128xf32, #tpu.memory_space<vmem>>, vector<1x4x128xf32>
    %19 = vector.shape_cast %18 : vector<1x4x128xf32> to vector<4x128xf32>
    %c0_16 = arith.constant 0 : index
    %c4_17 = arith.constant 4 : index
    %c0_18 = arith.constant 0 : index
    %20 = vector.load %arg4[%c0_16, %c4_17, %c0_18] : memref<1x8x128xf32, #tpu.memory_space<vmem>>, vector<1x4x128xf32>
    %21 = vector.shape_cast %20 : vector<1x4x128xf32> to vector<4x128xf32>
    %22 = vector.shape_cast %19 : vector<4x128xf32> to vector<1x4x128xf32>
    tpu.vector_store %arg4[%c0_16, %c4_17, %c0_18], %22 {strides = array<i32>} : memref<1x8x128xf32, #tpu.memory_space<vmem>>, vector<1x4x128xf32>,
    return
  }
  func.func @transform_0(%arg0: i32) -> (i32, i32, i32) {
    %c0_i32 = arith.constant 0 : i32
    %c0_i32_0 = arith.constant 0 : i32
    %c0_i32_1 = arith.constant 0 : i32
    return %arg0, %c0_i32, %c0_i32_0 : i32, i32, i32
  }
  func.func @transform_1(%arg0: i32) -> (i32, i32) {
    %c0_i32 = arith.constant 0 : i32
    %c0_i32_0 = arith.constant 0 : i32
    %c0_i32_1 = arith.constant 0 : i32
    return %c0_i32, %c0_i32_0 : i32, i32
  }
  func.func @transform_2(%arg0: i32) -> (i32, i32) {
    %c0_i32 = arith.constant 0 : i32
    %c0_i32_0 = arith.constant 0 : i32
    %c0_i32_1 = arith.constant 0 : i32
    return %c0_i32, %c0_i32_0 : i32, i32
  }
  func.func @transform_3(%arg0: i32) -> (i32, i32, i32) {
    %c0_i32 = arith.constant 0 : i32
    %c0_i32_0 = arith.constant 0 : i32
    %c0_i32_1 = arith.constant 0 : i32
    return %arg0, %c0_i32, %c0_i32_0 : i32, i32, i32
  }
}

module attributes {stable_mosaic.version = 11 : i64} {
  func.func @_loss_kernel(%arg0: i32, %arg1: memref<1x8x128xf32, #tpu.memory_space<vmem>>, %arg2: memref<1x4x128xf32, #tpu.memory_space<vmem>>, %arg3: memref<1x1x128xf32, #tpu.memory_space<vmem>>, %arg4: memref<1x3x128xf32, #tpu.memory_space<vmem>>, %arg5: memref<1x1x128xf32, #tpu.memory_space<vmem>>, %arg6: memref<1x128xf32, #tpu.memory_space<vmem>>, %arg7: memref<1x1x128xf32, #tpu.memory_space<vmem>>) attributes {dimension_semantics = [#tpu.dimension_semantics<parallel>], iteration_bounds = array<i64: 2>, scalar_prefetch = 0 : i64, scratch_operands = 0 : i64, tpu.core_type = #tpu.core_type<tc>, window_params = [{transform_indices = @transform_0, window_bounds = array<i64: 1, 8, 128>}, {transform_indices = @transform_1, window_bounds = array<i64: 1, 4, 128>}, {transform_indices = @transform_2, window_bounds = array<i64: 1, 1, 128>}, {transform_indices = @transform_3, window_bounds = array<i64: 1, 3, 128>}, {transform_indices = @transform_4, window_bounds = array<i64: 1, 1, 128>}, {pipeline_mode = #tpu.pipeline_mode<synchronous>, transform_indices = @transform_5, window_bounds = array<i64: 1, 128>}, {transform_indices = @transform_6, window_bounds = array<i64: 1, 1, 128>}]} {
    %c0 = arith.constant 0 : index
    %c0_0 = arith.constant 0 : index
    %c0_1 = arith.constant 0 : index
    %0 = vector.load %arg1[%c0, %c0_0, %c0_1] : memref<1x8x128xf32, #tpu.memory_space<vmem>>, vector<1x8x128xf32>
    %1 = vector.shape_cast %0 : vector<1x8x128xf32> to vector<8x128xf32>
    %2 = vector.extract_strided_slice %1 {offsets = [0, 0], sizes = [1, 128], strides = [1, 1]} : vector<8x128xf32> to vector<1x128xf32>
    %3 = vector.extract_strided_slice %1 {offsets = [1, 0], sizes = [1, 128], strides = [1, 1]} : vector<8x128xf32> to vector<1x128xf32>
    %4 = vector.extract_strided_slice %1 {offsets = [2, 0], sizes = [1, 128], strides = [1, 1]} : vector<8x128xf32> to vector<1x128xf32>
    %5 = vector.extract_strided_slice %1 {offsets = [3, 0], sizes = [1, 128], strides = [1, 1]} : vector<8x128xf32> to vector<1x128xf32>
    %c0_2 = arith.constant 0 : index
    %c0_3 = arith.constant 0 : index
    %c0_4 = arith.constant 0 : index
    %6 = vector.load %arg2[%c0_2, %c0_3, %c0_4] : memref<1x4x128xf32, #tpu.memory_space<vmem>>, vector<1x4x128xf32>
    %7 = vector.shape_cast %6 : vector<1x4x128xf32> to vector<4x128xf32>
    %8 = vector.extract_strided_slice %7 {offsets = [0, 0], sizes = [1, 128], strides = [1, 1]} : vector<4x128xf32> to vector<1x128xf32>
    %9 = vector.extract_strided_slice %7 {offsets = [1, 0], sizes = [1, 128], strides = [1, 1]} : vector<4x128xf32> to vector<1x128xf32>
    %10 = vector.extract_strided_slice %7 {offsets = [2, 0], sizes = [1, 128], strides = [1, 1]} : vector<4x128xf32> to vector<1x128xf32>
    %11 = vector.extract_strided_slice %7 {offsets = [3, 0], sizes = [1, 128], strides = [1, 1]} : vector<4x128xf32> to vector<1x128xf32>
    %c0_5 = arith.constant 0 : index
    %c0_6 = arith.constant 0 : index
    %c0_7 = arith.constant 0 : index
    %12 = vector.load %arg5[%c0_5, %c0_6, %c0_7] : memref<1x1x128xf32, #tpu.memory_space<vmem>>, vector<1x1x128xf32>
    %13 = vector.shape_cast %12 : vector<1x1x128xf32> to vector<1x128xf32>
    %c0_8 = arith.constant 0 : index
    %c0_9 = arith.constant 0 : index
    %14 = vector.load %arg6[%c0_8, %c0_9] : memref<1x128xf32, #tpu.memory_space<vmem>>, vector<1x128xf32>
    %cst = arith.constant 5.000000e-01 : f32
    %15 = vector.broadcast %cst : f32 to vector<1x128xf32>
    %16 = arith.mulf %15, %4 : vector<1x128xf32>
    %17 = arith.subf %2, %16 : vector<1x128xf32>
    %cst_10 = arith.constant 5.000000e-01 : f32
    %18 = vector.broadcast %cst_10 : f32 to vector<1x128xf32>
    %19 = arith.mulf %18, %10 : vector<1x128xf32>
    %20 = arith.subf %8, %19 : vector<1x128xf32>
    %21 = arith.maximumf %17, %20 : vector<1x128xf32>
    %cst_11 = arith.constant 5.000000e-01 : f32
    %22 = vector.broadcast %cst_11 : f32 to vector<1x128xf32>
    %23 = arith.mulf %22, %4 : vector<1x128xf32>
    %24 = arith.addf %2, %23 : vector<1x128xf32>
    %cst_12 = arith.constant 5.000000e-01 : f32
    %25 = vector.broadcast %cst_12 : f32 to vector<1x128xf32>
    %26 = arith.mulf %25, %10 : vector<1x128xf32>
    %27 = arith.addf %8, %26 : vector<1x128xf32>
    %28 = arith.minimumf %24, %27 : vector<1x128xf32>
    %cst_13 = arith.constant 5.000000e-01 : f32
    %29 = vector.broadcast %cst_13 : f32 to vector<1x128xf32>
    %30 = arith.mulf %29, %5 : vector<1x128xf32>
    %31 = arith.subf %3, %30 : vector<1x128xf32>
    %cst_14 = arith.constant 5.000000e-01 : f32
    %32 = vector.broadcast %cst_14 : f32 to vector<1x128xf32>
    %33 = arith.mulf %32, %11 : vector<1x128xf32>
    %34 = arith.subf %9, %33 : vector<1x128xf32>
    %35 = arith.maximumf %31, %34 : vector<1x128xf32>
    %cst_15 = arith.constant 5.000000e-01 : f32
    %36 = vector.broadcast %cst_15 : f32 to vector<1x128xf32>
    %37 = arith.mulf %36, %5 : vector<1x128xf32>
    %38 = arith.addf %3, %37 : vector<1x128xf32>
    %cst_16 = arith.constant 5.000000e-01 : f32
    %39 = vector.broadcast %cst_16 : f32 to vector<1x128xf32>
    %40 = arith.mulf %39, %11 : vector<1x128xf32>
    %41 = arith.addf %9, %40 : vector<1x128xf32>
    %42 = arith.minimumf %38, %41 : vector<1x128xf32>
    %43 = arith.cmpf olt, %21, %28 : vector<1x128xf32>
    %44 = arith.cmpf olt, %35, %42 : vector<1x128xf32>
    %45 = arith.andi %43, %44 : vector<1x128xi1>
    %46 = arith.extui %45 : vector<1x128xi1> to vector<1x128xi32>
    %47 = arith.sitofp %46 : vector<1x128xi32> to vector<1x128xf32>
    %48 = arith.subf %28, %21 : vector<1x128xf32>
    %49 = arith.subf %42, %35 : vector<1x128xf32>
    %50 = arith.mulf %48, %49 : vector<1x128xf32>
    %51 = arith.mulf %50, %47 : vector<1x128xf32>
    %52 = arith.mulf %4, %5 : vector<1x128xf32>
    %53 = arith.mulf %10, %11 : vector<1x128xf32>
    %54 = arith.addf %52, %53 : vector<1x128xf32>
    %55 = arith.subf %54, %51 : vector<1x128xf32>
    %cst_17 = arith.constant 1.000000e-16 : f32
    %56 = vector.broadcast %cst_17 : f32 to vector<1x128xf32>
    %57 = arith.addf %55, %56 : vector<1x128xf32>
    %58 = arith.divf %51, %57 : vector<1x128xf32>
    %59 = arith.mulf %58, %58 : vector<1x128xf32>
    %cst_18 = arith.constant 1.000000e+00 : f32
    %60 = vector.broadcast %cst_18 : f32 to vector<1x128xf32>
    %61 = arith.subf %60, %59 : vector<1x128xf32>
    %62 = arith.mulf %61, %13 : vector<1x128xf32>
    %63 = vector.shape_cast %62 : vector<1x128xf32> to vector<1x1x128xf32>
    %cst_19 = arith.constant dense<0.000000e+00> : vector<1xf32>
    %64 = vector.multi_reduction <add>, %63, %cst_19 [1, 2] : vector<1x1x128xf32> to vector<1xf32>
    %65 = vector.shape_cast %64 : vector<1xf32> to vector<1x1x1xf32>
    %66 = vector.extract %65[0, 0, 0] : f32 from vector<1x1x1xf32>
    %67 = vector.broadcast %66 : f32 to vector<1x1xf32>
    %68 = vector.extract_strided_slice %1 {offsets = [4, 0], sizes = [1, 128], strides = [1, 1]} : vector<8x128xf32> to vector<1x128xf32>
    %c0_20 = arith.constant 0 : index
    %c0_21 = arith.constant 0 : index
    %c0_22 = arith.constant 0 : index
    %69 = vector.load %arg3[%c0_20, %c0_21, %c0_22] : memref<1x1x128xf32, #tpu.memory_space<vmem>>, vector<1x1x128xf32>
    %70 = vector.shape_cast %69 : vector<1x1x128xf32> to vector<1x128xf32>
    %cst_23 = arith.constant 0.000000e+00 : f32
    %71 = vector.broadcast %cst_23 : f32 to vector<1x128xf32>
    %72 = arith.maximumf %68, %71 : vector<1x128xf32>
    %73 = arith.mulf %68, %70 : vector<1x128xf32>
    %74 = arith.subf %72, %73 : vector<1x128xf32>
    %75 = math.absf %68 : vector<1x128xf32>
    %cst_24 = arith.constant 0.000000e+00 : f32
    %76 = vector.broadcast %cst_24 : f32 to vector<1x128xf32>
    %77 = arith.subf %76, %75 : vector<1x128xf32>
    %78 = math.exp %77 : vector<1x128xf32>
    %cst_25 = arith.constant 1.000000e+00 : f32
    %79 = vector.broadcast %cst_25 : f32 to vector<1x128xf32>
    %80 = arith.addf %79, %78 : vector<1x128xf32>
    %81 = math.log %80 : vector<1x128xf32>
    %82 = arith.addf %74, %81 : vector<1x128xf32>
    %83 = arith.mulf %82, %14 : vector<1x128xf32>
    %84 = vector.shape_cast %83 : vector<1x128xf32> to vector<1x1x128xf32>
    %cst_26 = arith.constant dense<0.000000e+00> : vector<1xf32>
    %85 = vector.multi_reduction <add>, %84, %cst_26 [1, 2] : vector<1x1x128xf32> to vector<1xf32>
    %86 = vector.shape_cast %85 : vector<1xf32> to vector<1x1x1xf32>
    %87 = vector.extract %86[0, 0, 0] : f32 from vector<1x1x1xf32>
    %88 = vector.broadcast %87 : f32 to vector<1x1xf32>
    %89 = vector.extract_strided_slice %1 {offsets = [5, 0], sizes = [3, 128], strides = [1, 1]} : vector<8x128xf32> to vector<3x128xf32>
    %c0_27 = arith.constant 0 : index
    %c0_28 = arith.constant 0 : index
    %c0_29 = arith.constant 0 : index
    %90 = vector.load %arg4[%c0_27, %c0_28, %c0_29] : memref<1x3x128xf32, #tpu.memory_space<vmem>>, vector<1x3x128xf32>
    %91 = vector.shape_cast %90 : vector<1x3x128xf32> to vector<3x128xf32>
    %cst_30 = arith.constant 0.000000e+00 : f32
    %92 = vector.broadcast %cst_30 : f32 to vector<3x128xf32>
    %93 = arith.maximumf %89, %92 : vector<3x128xf32>
    %94 = arith.mulf %89, %91 : vector<3x128xf32>
    %95 = arith.subf %93, %94 : vector<3x128xf32>
    %96 = math.absf %89 : vector<3x128xf32>
    %cst_31 = arith.constant 0.000000e+00 : f32
    %97 = vector.broadcast %cst_31 : f32 to vector<3x128xf32>
    %98 = arith.subf %97, %96 : vector<3x128xf32>
    %99 = math.exp %98 : vector<3x128xf32>
    %cst_32 = arith.constant 1.000000e+00 : f32
    %100 = vector.broadcast %cst_32 : f32 to vector<3x128xf32>
    %101 = arith.addf %100, %99 : vector<3x128xf32>
    %102 = math.log %101 : vector<3x128xf32>
    %103 = arith.addf %95, %102 : vector<3x128xf32>
    %104 = vector.broadcast %13 : vector<1x128xf32> to vector<3x128xf32>
    %105 = arith.mulf %103, %104 : vector<3x128xf32>
    %106 = vector.shape_cast %105 : vector<3x128xf32> to vector<1x3x128xf32>
    %cst_33 = arith.constant dense<0.000000e+00> : vector<1xf32>
    %107 = vector.multi_reduction <add>, %106, %cst_33 [1, 2] : vector<1x3x128xf32> to vector<1xf32>
    %108 = vector.shape_cast %107 : vector<1xf32> to vector<1x1x1xf32>
    %109 = vector.extract %108[0, 0, 0] : f32 from vector<1x1x1xf32>
    %110 = vector.broadcast %109 : f32 to vector<1x1xf32>
    %111 = tpu.iota {dimensions = array<i32: 1>} : vector<1x128xi32>
    %c0_i32 = arith.constant 0 : i32
    %112 = vector.broadcast %c0_i32 : i32 to vector<1x128xi32>
    %113 = arith.cmpi eq, %111, %112 : vector<1x128xi32>
    %cst_34 = arith.constant 0.000000e+00 : f32
    %114 = vector.shape_cast %67 : vector<1x1xf32> to vector<1x1xf32>
    %115 = vector.broadcast %114 : vector<1x1xf32> to vector<1x128xf32>
    %116 = vector.broadcast %cst_34 : f32 to vector<1x128xf32>
    %117 = arith.select %113, %115, %116 : vector<1x128xi1>, vector<1x128xf32>
    %c1_i32 = arith.constant 1 : i32
    %118 = vector.broadcast %c1_i32 : i32 to vector<1x128xi32>
    %119 = arith.cmpi eq, %111, %118 : vector<1x128xi32>
    %cst_35 = arith.constant 0.000000e+00 : f32
    %120 = vector.shape_cast %88 : vector<1x1xf32> to vector<1x1xf32>
    %121 = vector.broadcast %120 : vector<1x1xf32> to vector<1x128xf32>
    %122 = vector.broadcast %cst_35 : f32 to vector<1x128xf32>
    %123 = arith.select %119, %121, %122 : vector<1x128xi1>, vector<1x128xf32>
    %124 = arith.addf %117, %123 : vector<1x128xf32>
    %c2_i32 = arith.constant 2 : i32
    %125 = vector.broadcast %c2_i32 : i32 to vector<1x128xi32>
    %126 = arith.cmpi eq, %111, %125 : vector<1x128xi32>
    %cst_36 = arith.constant 0.000000e+00 : f32
    %127 = vector.shape_cast %110 : vector<1x1xf32> to vector<1x1xf32>
    %128 = vector.broadcast %127 : vector<1x1xf32> to vector<1x128xf32>
    %129 = vector.broadcast %cst_36 : f32 to vector<1x128xf32>
    %130 = arith.select %126, %128, %129 : vector<1x128xi1>, vector<1x128xf32>
    %131 = arith.addf %124, %130 : vector<1x128xf32>
    %c0_37 = arith.constant 0 : index
    %c0_38 = arith.constant 0 : index
    %c0_39 = arith.constant 0 : index
    %132 = vector.load %arg7[%c0_37, %c0_38, %c0_39] : memref<1x1x128xf32, #tpu.memory_space<vmem>>, vector<1x1x128xf32>
    %133 = vector.shape_cast %132 : vector<1x1x128xf32> to vector<1x128xf32>
    %134 = vector.shape_cast %131 : vector<1x128xf32> to vector<1x1x128xf32>
    tpu.vector_store %arg7[%c0_37, %c0_38, %c0_39], %134 {strides = array<i32>} : memref<1x1x128xf32, #tpu.memory_space<vmem>>, vector<1x1x128xf32>,
    return
  }
  func.func @transform_0(%arg0: i32) -> (i32, i32, i32) {
    %c0_i32 = arith.constant 0 : i32
    %c0_i32_0 = arith.constant 0 : i32
    %c0_i32_1 = arith.constant 0 : i32
    return %arg0, %c0_i32, %c0_i32_0 : i32, i32, i32
  }
  func.func @transform_1(%arg0: i32) -> (i32, i32, i32) {
    %c0_i32 = arith.constant 0 : i32
    %c0_i32_0 = arith.constant 0 : i32
    %c0_i32_1 = arith.constant 0 : i32
    return %arg0, %c0_i32, %c0_i32_0 : i32, i32, i32
  }
  func.func @transform_2(%arg0: i32) -> (i32, i32, i32) {
    %c0_i32 = arith.constant 0 : i32
    %c0_i32_0 = arith.constant 0 : i32
    %c0_i32_1 = arith.constant 0 : i32
    return %arg0, %c0_i32, %c0_i32_0 : i32, i32, i32
  }
  func.func @transform_3(%arg0: i32) -> (i32, i32, i32) {
    %c0_i32 = arith.constant 0 : i32
    %c0_i32_0 = arith.constant 0 : i32
    %c0_i32_1 = arith.constant 0 : i32
    return %arg0, %c0_i32, %c0_i32_0 : i32, i32, i32
  }
  func.func @transform_4(%arg0: i32) -> (i32, i32, i32) {
    %c0_i32 = arith.constant 0 : i32
    %c0_i32_0 = arith.constant 0 : i32
    %c0_i32_1 = arith.constant 0 : i32
    return %arg0, %c0_i32, %c0_i32_0 : i32, i32, i32
  }
  func.func @transform_5(%arg0: i32) -> (i32, i32) {
    %c0_i32 = arith.constant 0 : i32
    %c0_i32_0 = arith.constant 0 : i32
    %c0_i32_1 = arith.constant 0 : i32
    return %c0_i32, %c0_i32_0 : i32, i32
  }
  func.func @transform_6(%arg0: i32) -> (i32, i32, i32) {
    %c0_i32 = arith.constant 0 : i32
    %c0_i32_0 = arith.constant 0 : i32
    %c0_i32_1 = arith.constant 0 : i32
    return %arg0, %c0_i32, %c0_i32_0 : i32, i32, i32
  }
}

</mosaic_0001>

<bundles_post_ra>
// kernel: _lambda_.3
= control target key start
LH: loop header
LB: loop body
LE: loop exit
PB: predicated region body
PF: predicated region fallthrough
CT: control target
= control target key end

     0   :  { %s286_s12 = smov 0   ;;  %s303_s0 = inlined_call_operand.vmem [shape: f32[2,8,128], index: 0, kind: input, shape index: {}]   ;;  %s304_s1 = inlined_call_operand.vmem [shape: f32[2,128], index: 1, kind: input, shape index: {}]   ;;  %s305_s2 = inlined_call_operand.vmem [shape: f32[1,128], index: 2, kind: input, shape index: {}]   ;;  %s306_s3 = inlined_call_operand.vmem [shape: f32[2,8,128], index: 3, kind: output, shape index: {}]  }
   0x1 LB: > { %s238_s13 = sadd.s32 4294967295, %s264_s12   ;;  %p242_p0 = scmp.ge.s32.totalorder %s264_s12, 1  ;;  %s264_s12 = sphi %s286_s12, %s13_s12  }
   0x2   : > { %p136_p1 = scmp.lt.s32.totalorder %s264_s12, 3 }
   0x4   : > { %p137_p2 = pnand %p242_p0, %p136_p1 }
   0x5   : > { %p158_p3 = scmp.lt.s32.totalorder (!%p137_p2), %s238_s13, 1  ;;  %v168_v0 = vld [vmem:[%s304_s1] sm:$0x3] (!%p137_p2) }
   0x6   : > { %140 = sbr.rel (%p137_p2) target bundleno = 33 (0x21), region = 32  ;;  %v245_v1 = vld [vmem:[%s305_s2] ss:$0 sm:$0xff] (!%p137_p2) }
   0xd   : > { %s308_s13 = smov (!%p158_p3, %s238_s13), 1 }
   0xe   : > { %s243_s14 = sshll.u32 %s308_s13, 3 }
   0xf   : > { %s161_s19 = scalar_lea.vmem %s303_s0, %s243_s14  ;;  %s165_s22 = scalar_lea.vmem %s306_s3, %s243_s14 }
  0x10   : > { %v167_v2 = vld [vmem:[%s161_s19] sm:$0x3]  ;;  %v178_v3 = vld [vmem:[%s161_s19 + $0x2] sm:$0x3]  ;;  %v183_v4 = vld [vmem:[%s161_s19 + $0x4] sm:$0xf] }
  0x11   : > { %v169_v5 = vadd.f32 %v168_v0, %v167_v2  ;;  %v179_v6 = vmul.f32 1.442695, %v178_v3  ;;  %184 = vst [vmem:[%s165_s22 + $0x4] sm:$0xf] %v183_v4 }
  0x13   : > { %v176_v7 = vmul.f32 %v245_v1, %v169_v5  ;;  %256 = vpow2.f32 %v179_v6 }
  0x15   : > { %177 = vst [vmem:[%s165_s22] sm:$0x3] %v176_v7 }
  0x1d   : > { %v257_v8 = vpop.eup %256 }
  0x1e   : > { %v181_v9 = vmul.f32 %v257_v8, %v245_v1 }
  0x20   : > { %182 = vst [vmem:[%s165_s22 + $0x2] sm:$0x3] %v181_v9 }
  0x21 PF: > { %s13_s12 = sadd.s32 1, %s264_s12  }
  0x22   : > { %p10_p4 = scmp.ge.s32.totalorder %s13_s12, 4  }
  0x24   :  { %12 = sbr.rel (!%p10_p4) target bundleno = 1 (0x1), region = 62 }

// kernel: _lambda_.4
= control target key start
LH: loop header
LB: loop body
LE: loop exit
PB: predicated region body
PF: predicated region fallthrough
CT: control target
= control target key end

     0   :  { %s925_s27 = smov 0   ;;  %s1047_s0 = inlined_call_operand.vmem [shape: f32[2,8,4], index: 0, kind: input, shape index: {}]   ;;  %s1048_s1 = inlined_call_operand.vmem [shape: f32[2,8,3], index: 1, kind: input, shape index: {}]   ;;  %s1049_s2 = inlined_call_operand.vmem [shape: f32[2,8,1], index: 2, kind: input, shape index: {}]   ;;  %s1050_s3 = inlined_call_operand.vmem [shape: f32[2,128], index: 3, kind: input, shape index: {}]   ;;  %s1051_s4 = inlined_call_operand.vmem [shape: f32[1,128], index: 4, kind: input, shape index: {}]   ;;  %s1052_s5 = inlined_call_operand.vmem [shape: f32[1,128], index: 5, kind: input, shape index: {}]   ;;  %s1053_s6 = inlined_call_operand.vmem [shape: f32[2,8,128], index: 6, kind: input, shape index: {}]   ;;  %s1054_s7 = inlined_call_operand.vmem [shape: f32[2,8,128], index: 7, kind: output, shape index: {0}]   ;;  %s1055_s8 = inlined_call_operand.vmem [shape: f32[2,8,128], index: 8, kind: output, shape index: {1}]  }
   0x1 LB: > { %s803_s28 = sadd.s32 4294967295, %s871_s27   ;;  %p807_p0 = scmp.ge.s32.totalorder %s871_s27, 1  ;;  %s871_s27 = sphi %s925_s27, %s19_s27  }
   0x2   : > { %p291_p1 = scmp.lt.s32.totalorder %s871_s27, 3 }
   0x4   : > { %p292_p2 = pnand %p807_p0, %p291_p1 }
   0x5   : > { %p339_p3 = scmp.lt.s32.totalorder (!%p292_p2), %s803_s28, 1  ;;  %v873_v0 = vmov (!%p292_p2), 0.0   ;;  %vm874_vm0 = vmmov (!%p292_p2), 0   ;;  %v875_v1 = vmov (!%p292_p2), 1   ;;  %v876_v2 = vmov (!%p292_p2), 0   ;;  %s877_s14 = smov (!%p292_p2), 126  }
   0x6   : > { %295 = sbr.rel (%p292_p2) target bundleno = 326 (0x146), region = 48  ;;  %826 = vmatprep.subr.mxu0 (!%p292_p2), %v873_v0  ;;  %828 = vmatprep.mubr.msk.f32.mxu0 (!%p292_p2), %vm874_vm0, %v873_v0  ;;  %s878_s15 = smov (!%p292_p2), 127   ;;  %v377_v11 = vlaneseq (!%p292_p2)  ;;  %vm560_vm1 = vcmask (!%p292_p2), 1042432   ;;  %vm570_vm2 = vcmask (!%p292_p2), 23552   ;;  %v879_v42 = vmov (!%p292_p2), 2  }
   0x7   : > { %847 = vset.pattern.permute.xlu0 (!%p292_p2), %v875_v1  ;;  %846 = vset.pattern.permute.xlu1 (!%p292_p2), %v876_v2  ;;  %v368_v50 = vld [vmem:[%s1050_s3 + $0x1] sm:$0x1] (!%p292_p2)  ;;  %v365_v53 = vld [vmem:[%s1050_s3] sm:$0x1] (!%p292_p2) }
   0x8   : > { %v954_v12 = vshrl.u32 (!%p292_p2), %v377_v11, 7  ;;  %v364_v56 = vld [vmem:[%s1051_s4] sm:$0x1] (!%p292_p2)  ;;  %v369_v57 = vadd.f32 (!%p292_p2), 0.5, %v368_v50  ;;  %v366_v62 = vadd.f32 (!%p292_p2), 0.5, %v365_v53 }
   0x9   : > { %v412_v61 = vmul.f32 (!%p292_p2), 2.5, %v364_v56 }
   0xa   : > { %v544_v16 = vsub.s32 (!%p292_p2), 4, %v954_v12  ;;  %v984_v48 = vsub.s32 (!%p292_p2), 0, %v954_v12  ;;  %v491_v51 = vsub.s32 (!%p292_p2), 1, %v954_v12 }
   0xc   : > { %v422_v11 = vrot.slane (!%p292_p2), %v412_v61, %v984_v48 }
   0xd   : > { %s1061_s28 = smov (!%p339_p3, %s803_s28), 1 }
   0xe   : > { %s937_s29 = sshll.u32 %s1061_s28, 3 }
   0xf   : > { %s342_s10 = scalar_lea.vmem %s1047_s0, %s937_s29  ;;  %s354_s13 = scalar_lea.vmem %s1053_s6, %s937_s29 }
  0x10   : > { %v947_v3 = vld [vmem:[%s342_s10] sm:$0xff]  ;;  %s346_s18 = scalar_lea.vmem %s1048_s1, %s937_s29  ;;  %s350_s21 = scalar_lea.vmem %s1049_s2, %s937_s29 }
  0x11   : > { %v949_v4 = vld [vmem:[%s354_s13] sm:$0xff]  ;;  %v371_v5 = vmul.f32 0.5, %v947_v3  ;;  %s362_s12 = scalar_lea.vmem %s1055_s8, %s937_s29 }
  0x12   : > { %v534_v6 = vand.u32 2147483647, %v949_v4  ;;  %v533_v13 = vmin.f32 %v949_v4, 0.0  ;;  %v555_v32 = vld [vmem:[%s346_s18] sm:$0xff]  ;;  %v473_v44 = vmul.f32 0.5, %v949_v4  ;;  %v513_v52 = vrot.slane %v949_v4, 1 }
  0x13   : > { %373 = vrot.lane.b32.xlu0 %v371_v5, %s877_s14  ;;  %v440_v33 = vld [vmem:[%s350_s21] sm:$0xff] }
  0x14   : > { %v535_v7 = vsub.f32 0.0, %v534_v6  ;;  %vm441_vm3 = vcmp.gt.f32.partialorder %v440_v33, 0.0  ;;  %v475_v45 = vrot.slane %v473_v44, 2  ;;  %v370_v6 = vmul.f32 %v369_v57, %v364_v56 }
  0x15   : > { %v820_v36 = vsel %vm441_vm3, 1.0, %v873_v0  ;;  %v445_v43 = vsel %vm441_vm3, 1, %v876_v2 }
  0x16   : > { %v536_v8 = vmul.f32 1.442695, %v535_v7  ;;  %v657_v37 = vsub.f32 1.0, %v820_v36  ;;  %v483_v47 = vadd.f32 %v475_v45, %v949_v4  ;;  %v477_v49 = vsub.f32 %v949_v4, %v475_v45 }
  0x17   : > { %508 = vrot.lane.b32.xlu0 %v947_v3, %s878_s15  ;;  %s358_s15 = scalar_lea.vmem %s1054_s7, %s937_s29 }
  0x18   : > { %853 = vpow2.f32 %v536_v8  ;;  %v658_v39 = vmul.f32 1e+09, %v657_v37  ;;  %v487_v54 = vrot.slane %v483_v47, %v984_v48  ;;  %v481_v58 = vrot.slane %v477_v49, %v984_v48 }
  0x19   : > { %v492_v59 = vrot.slane %v477_v49, %v491_v51  ;;  %v497_v60 = vrot.slane %v483_v47, %v491_v51 }
  0x22   : > { %v854_v9 = vpop.eup %853 }
  0x23   : > { %v538_v10 = vadd.f32 1.0, %v854_v9 }
  0x25   : > { %855 = vlog2.f32 %v538_v10 }
  0x2f   : > { %v856_v14 = vpop.eup %855 }
  0x30   : > { %v540_v15 = vmul.f32 0.6931472, %v856_v14 }
  0x32   : > { %v541_v17 = vsub.f32 %v533_v13, %v540_v15  ;;  %v367_v13 = vmul.f32 %v366_v62, %v364_v56 }
  0x34   : > { %v545_v18 = vrot.slane %v541_v17, %v544_v16 }
  0x36   : > { %v546_v19 = vadd.f32 %v545_v18, %v541_v17  ;;  %v397_v18 = vrot.slane %v370_v6, %v984_v48 }
  0x38   : > { %v547_v20 = vmul.f32 0.5, %v546_v19 }
  0x3a   : > { %v548_v21 = vmul.f32 1.442695, %v547_v20  ;;  %v550_v25 = vmax.f32 %v547_v20, -100.0 }
  0x3c   : > { %857 = vpow2.f32 %v548_v21 }
  0x46   : > { %v858_v22 = vpop.eup %857 }
  0x47   : > { %v551_v23 = vsub.f32 1.0, %v858_v22  ;;  %v442_v22 = vld [vmem:[%s1052_s5] sm:$0x1] }
  0x48   : > { %vm443_vm7 = vcmp.gt.f32.partialorder %v442_v22, 0.0 }
  0x49   : > { %859 = vlog2.f32 %v551_v23  ;;  %v380_v23 = vrot.slane %v367_v13, %v984_v48 }
  0x53   : > { %v860_v24 = vpop.eup %859 }
  0x54   : > { %v553_v26 = vmul.f32 0.6931472, %v860_v24 }
  0x56   : > { %v554_v27 = vmax.f32 %v553_v26, -100.0 }
  0x58   : > { %v556_v28 = vsub.f32 %v550_v25, %v554_v27  ;;  %v558_v29 = vrot.slane %v554_v27, 5 }
  0x5a   : > { %v962_v30 = vsel %vm560_vm1, %v558_v29, 0.0  ;;  %v569_v31 = vrot.slane %v556_v28, 5 }
  0x5b   : > { %v562_v27 = vrot.slane %v962_v30, 4 }
  0x5c   : > { %827 = vmatpush3.msk.msra.mxu0 %vm560_vm1, %v569_v31 }
  0x5d   : > { %829 = vmatmul.mubr.msk.f32.vlgmr.msra.gmra.mrb[0].mxu0 %vm570_vm2, %v555_v32 }
  0x85   : > { %v374_v34 = vpop.permute.xlu0 %373 }
  0x86   : > { %v376_v35 = vsub.f32 %v947_v3, %v374_v34  ;;  %v387_v38 = vadd.f32 %v374_v34, %v947_v3 }
  0x88   : > { %399 = vperm.xlu0 %847, %v376_v35   ;;  %383 = vperm.xlu1 %846, %v376_v35  }
  0x89   : > { %v509_v40 = vpop.permute.xlu0 %508 }
  0x8a   : > { %v511_v41 = vmul.f32 %v509_v40, %v947_v3  ;;  %v451_v40 = vsel %vm443_vm7, 1, %v876_v2 }
  0x8b   : > { %v455_v47 = vrot.slane %v451_v40, %v984_v48 }
  0x8c   : > { %390 = vperm.xlu1 %846, %v387_v38   ;;  %850 = vset.pattern.permute.xlu0 %v876_v2 }
  0x8d   : > { %415 = vperm.xlu0 %850, %v947_v3   ;;  %vm456_vm9 = vcmp.eq.s32.totalorder %v455_v47, 1 }
  0x90   : > { %848 = vset.pattern.permute.xlu1 %v875_v1 }
  0x91   : > { %404 = vperm.xlu1 %848, %v387_v38   ;;  %661 = vperm.xlu0 %850, %v658_v39   ;;  %v563_v39 = vadd.f32 %v562_v27, %v962_v30 }
  0x95   : > { %849 = vset.pattern.permute.xlu1 %v879_v42 }
  0x96   : > { %518 = vperm.xlu1 %849, %v511_v41  }
  0x9a   : > { %851 = vset.pattern.permute.xlu1 %v875_v1  ;;  %v515_v1 = vmul.f32 %v513_v52, %v949_v4 }
  0x9b   : > { %429 = vperm.xlu1 %851, %v947_v3   ;;  %v523_v3 = vsub.s32 2, %v954_v12 }
  0x9d   : > { %v524_v14 = vrot.slane %v515_v1, %v523_v3 }
  0x9f   : > { %852 = vset.pattern.permute.xlu1 %v876_v2 }
  0xa0   : > { %447 = vperm.xlu1 %852, %v445_v43  }
  0xa4   : > { %678 = vperm.xlu1 %852, %v820_v36  }
 0x107   : > { %v384_v46 = vpop.permute.xlu1 %383  ;;  %v400_v63 = vpop.permute.xlu0 %399 }
 0x108   : > { %v482_v8 = vmax.f32 %v384_v46, %v481_v58  ;;  %v493_v9 = vmax.f32 %v400_v63, %v492_v59  ;;  %v402_v28 = vsub.f32 %v397_v18, %v400_v63  ;;  %v386_v34 = vsub.f32 %v380_v23, %v384_v46 }
 0x109   : > { %v564_v46 = vrot.slane %v563_v39, 2 }
 0x10b   : > { %v391_v55 = vpop.permute.xlu1 %390  ;;  %v565_v2 = vadd.f32 %v564_v46, %v563_v39 }
 0x10c   : > { %v488_v5 = vmin.f32 %v391_v55, %v487_v54  ;;  %v416_v15 = vpop.permute.xlu0 %415  ;;  %v393_v29 = vsub.f32 %v391_v55, %v380_v23 }
 0x10d   : > { %v424_v20 = vsub.f32 %v416_v15, %v422_v11  ;;  %v426_v21 = vadd.f32 %v422_v11, %v416_v15  ;;  %v566_v58 = vrot.slane %v565_v2, 1 }
 0x10e   : > { %vm499_vm4 = vcmp.lt.f32.partialorder %v482_v8, %v488_v5  ;;  %v504_v16 = vsub.f32 %v488_v5, %v482_v8  ;;  %v408_v41 = vmin.f32 %v386_v34, %v393_v29  ;;  %v821_v8 = vsel %vm443_vm7, 1.0, %v873_v0 }
 0x10f   : > { %v425_v32 = vsub.f32 %v380_v23, %v424_v20  ;;  %v427_v33 = vsub.f32 %v426_v21, %v380_v23  ;;  %v567_v61 = vadd.f32 %v566_v58, %v565_v2 }
 0x110   : > { %v405_v7 = vpop.permute.xlu1 %404 }
 0x111   : > { %v498_v10 = vmin.f32 %v405_v7, %v497_v60  ;;  %v407_v25 = vsub.f32 %v405_v7, %v397_v18  ;;  %v436_v44 = vmin.f32 %v425_v32, %v427_v33 }
 0x113   : > { %vm500_vm5 = vcmp.lt.f32.partialorder %v493_v9, %v498_v10  ;;  %v505_v17 = vsub.f32 %v498_v10, %v493_v9  ;;  %v409_v36 = vmin.f32 %v402_v28, %v407_v25 }
 0x114   : > { %vm501_vm6 = vmand %vm499_vm4, %vm500_vm5 }
 0x115   : > { %v506_v4 = vmul.f32 %v505_v17, %v504_v16  ;;  %v519_v12 = vpop.permute.xlu1 %518  ;;  %v817_v19 = vsel %vm501_vm6, 1.0, %v873_v0  ;;  %v410_v50 = vmin.f32 %v408_v41, %v409_v36 }
 0x116   : > { %v525_v24 = vadd.f32 %v524_v14, %v519_v12  ;;  %v665_v14 = vsub.f32 1.0, %v821_v8 }
 0x117   : > { %v507_v26 = vmul.f32 %v817_v19, %v506_v4  ;;  %vm1014_vm10 = vcmp.gt.f32.partialorder %v410_v50, 0.0 }
 0x118   : > { %v666_v20 = vmul.f32 1e+09, %v665_v14 }
 0x119   : > { %v526_v31 = vsub.f32 %v525_v24, %v507_v26 }
 0x11a   : > { %v430_v35 = vpop.permute.xlu1 %429  ;;  %v671_v24 = vrot.slane %v666_v20, %v984_v48 }
 0x11b   : > { %861 = vrcp.f32 %v526_v31  ;;  %v432_v37 = vsub.f32 %v430_v35, %v422_v11  ;;  %v434_v38 = vadd.f32 %v430_v35, %v422_v11 }
 0x11d   : > { %v433_v42 = vsub.f32 %v397_v18, %v432_v37  ;;  %v435_v43 = vsub.f32 %v434_v38, %v397_v18 }
 0x11f   : > { %v437_v45 = vmin.f32 %v433_v42, %v435_v43  ;;  %v448_v49 = vpop.permute.xlu1 %447 }
 0x120   : > { %vm449_vm8 = vcmp.eq.s32.totalorder %v448_v49, 1 }
 0x121   : > { %v438_v51 = vmin.f32 %v436_v44, %v437_v45 }
 0x123   : > { %vm1018_vm11 = vcmp.gt.f32.partialorder %v438_v51, 0.0  ;;  %v679_v16 = vpop.permute.xlu1 %678 }
 0x124   : > { %vm444_vm12 = vmor %vm1014_vm10, %vm1018_vm11 }
 0x125   : > { %v862_v53 = vpop.eup %861  ;;  %vm450_vm13 = vmand %vm444_vm12, %vm449_vm8 }
 0x126   : > { %vm457_vm14 = vmand %vm450_vm13, %vm456_vm9  ;;  %v528_v54 = vmul.f32 %v862_v53, %v507_v26  ;;  %v662_v26 = vpop.permute.xlu0 %661 }
 0x127   : > { %v814_v55 = vsel %vm457_vm14, 1.0, %v873_v0  ;;  %vm469_vm15 = vmand %vm1014_vm10, %vm1018_vm11 }
 0x128   : > { %v460_v56 = vrot.slane %v814_v55, 4  ;;  %v529_v57 = vadd.f32 1e-08, %v528_v54  ;;  %v816_v9 = vsel %vm469_vm15, 1.0, %v873_v0 }
 0x129   : > { %v651_v15 = vsub.f32 1.0, %v816_v9 }
 0x12a   : > { %v461_v59 = vadd.f32 %v814_v55, %v460_v56  ;;  %863 = vlog2.f32 %v529_v57 }
 0x12b   : > { %v652_v21 = vmul.f32 100000.0, %v651_v15 }
 0x12c   : > { %v462_v60 = vrot.slane %v461_v59, 2 }
 0x12e   : > { %v463_v62 = vadd.f32 %v462_v60, %v461_v59 }
 0x130   : > { %v642_v63 = vpop.f32.mrb[0].mxu0  ;;  %v464_v1 = vrot.slane %v463_v62, 1 }
 0x131   : > { %v643_v3 = vadd.f32 %v642_v63, %v567_v61  ;;  %v830_v5 = vpop.f32.mrb[1].mxu0 }
 0x132   : > { %v465_v6 = vadd.f32 %v464_v1, %v463_v62 }
 0x133   : > { %v646_v18 = vsub.f32 0.0, %v643_v3 }
 0x134   : > { %v864_v7 = vpop.eup %863  ;;  %vm466_vm0 = vcmp.gt.f32.partialorder %v465_v6, 0.0 }
 0x135   : > { %v815_v10 = vsel %vm466_vm0, 1.0, %v873_v0  ;;  %v531_v11 = vmul.f32 0.6931472, %v864_v7 }
 0x136   : > { %v675_v13 = vmul.f32 %v815_v10, %v528_v54  ;;  %v654_v12 = vsub.f32 1.0, %v815_v10 }
 0x137   : > { %v532_v17 = vsub.f32 0.0, %v531_v11 }
 0x138   : > { %v681_v4 = vmul.f32 %v679_v16, %v675_v13  ;;  %v655_v0 = vmul.f32 1e+09, %v654_v12 }
 0x139   : > { %v649_v19 = vmul.f32 3.0, %v532_v17 }
 0x13a   : > { %682 = vst [vmem:[%s362_s12] sm:$0xff] %v681_v4 }
 0x13b   : > { %v650_v22 = vadd.f32 %v649_v19, %v646_v18 }
 0x13d   : > { %v653_v23 = vadd.f32 %v652_v21, %v650_v22 }
 0x13f   : > { %v656_v25 = vadd.f32 %v655_v0, %v653_v23 }
 0x141   : > { %v664_v27 = vadd.f32 %v662_v26, %v656_v25 }
 0x143   : > { %v673_v28 = vadd.f32 %v671_v24, %v664_v27 }
 0x145   : > { %674 = vst [vmem:[%s358_s15] sm:$0xff] %v673_v28 }
 0x146 PF: > { %s19_s27 = sadd.s32 1, %s871_s27  }
 0x147   : > { %p16_p4 = scmp.ge.s32.totalorder %s19_s27, 4  }
 0x149   :  { %18 = sbr.rel (!%p16_p4) target bundleno = 1 (0x1), region = 99 }

// kernel: _lambda_.5
= control target key start
LH: loop header
LB: loop body
LE: loop exit
PB: predicated region body
PF: predicated region fallthrough
CT: control target
= control target key end

     0   :  { %s620_s21 = smov 0   ;;  %s665_s0 = inlined_call_operand.vmem [shape: f32[2,8,128], index: 0, kind: input, shape index: {}]   ;;  %s666_s1 = inlined_call_operand.vmem [shape: f32[2,4,128], index: 1, kind: input, shape index: {}]   ;;  %s667_s2 = inlined_call_operand.vmem [shape: f32[2,1,128], index: 2, kind: input, shape index: {}, may-alias: {2,4}]   ;;  %s668_s3 = inlined_call_operand.vmem [shape: f32[2,3,128], index: 3, kind: input, shape index: {}]   ;;  %s669_s4 = inlined_call_operand.vmem [shape: f32[2,1,128], index: 4, kind: input, shape index: {}, may-alias: {2,4}]   ;;  %s670_s5 = inlined_call_operand.vmem [shape: f32[1,128], index: 5, kind: input, shape index: {}]   ;;  %s671_s6 = inlined_call_operand.vmem [shape: f32[2,1,128], index: 6, kind: output, shape index: {}]  }
   0x1 LB: > { %s540_s22 = sadd.s32 4294967295, %s581_s21   ;;  %p544_p0 = scmp.ge.s32.totalorder %s581_s21, 1  ;;  %s581_s21 = sphi %s620_s21, %s16_s21  }
   0x2   : > { %p245_p1 = scmp.lt.s32.totalorder %s581_s21, 3 }
   0x4   : > { %p246_p2 = pnand %p544_p0, %p245_p1 }
   0x5   : > { %p286_p3 = scmp.lt.s32.totalorder (!%p246_p2), %s540_s22, 1  ;;  %v583_v18 = vmov (!%p246_p2), 0   ;;  %v584_v25 = vmov (!%p246_p2), 0.0   ;;  %v417_v32 = vlaneseq (!%p246_p2)  ;;  %vm426_vm3 = vcmask (!%p246_p2), 1042432   ;;  %v550_v55 = vld [vmem:[%s670_s5] ss:$0 sm:$0xff] (!%p246_p2) }
   0x6   : > { %249 = sbr.rel (%p246_p2) target bundleno = 278 (0x116), region = 44  ;;  %vm360_vm4 = vcmask (!%p246_p2), 1040384  }
   0x7   : > { %v418_v36 = vshrl.u32 (!%p246_p2), %v417_v32, 7 }
   0x9   : > { %v419_v42 = vsub.s32 (!%p246_p2), 0, %v418_v36 }
   0xd   : > { %s673_s22 = smov (!%p286_p3, %s540_s22), 1 }
   0xe   : > { %s545_s23 = sshll.u32 %s673_s22, 3  ;;  %s546_s24 = sshll.u32 %s673_s22, 2 }
   0xf   : > { %s289_s27 = scalar_lea.vmem %s665_s0, %s545_s23  ;;  %s293_s30 = scalar_lea.vmem %s666_s1, %s546_s24 }
  0x10   : > { %v307_v0 = vld [vmem:[%s289_s27] sm:$0xff]  ;;  %s300_s9 = scalar_lea.vmem %s668_s3, %s546_s24  ;;  %s296_s12 = scalar_lea.vmem %s667_s2, %s673_s22 }
  0x11   : > { %v308_v1 = vld [vmem:[%s293_s30] sm:$0xf]  ;;  %v381_v2 = vand.u32 2147483647, %v307_v0  ;;  %v311_v3 = vmul.f32 0.5, %v307_v0  ;;  %v339_v15 = vrot.slane %v307_v0, 1  ;;  %s303_s15 = scalar_lea.vmem %s669_s4, %s673_s22  ;;  %s306_s25 = scalar_lea.vmem %s671_s6, %s673_s22 }
  0x12   : > { %v316_v4 = vmul.f32 0.5, %v308_v1  ;;  %v343_v16 = vrot.slane %v308_v1, 1  ;;  %v409_v31 = vld [vmem:[%s300_s9] sm:$0x7]  ;;  %v372_v38 = vmax.f32 %v307_v0, 0.0 }
  0x13   : > { %v382_v5 = vsub.f32 0.0, %v381_v2  ;;  %v313_v6 = vrot.slane %v311_v3, 2  ;;  %v341_v22 = vmul.f32 %v339_v15, %v307_v0  ;;  %v411_v34 = vrot.slane %v409_v31, 3  ;;  %v549_v41 = vld [vmem:[%s296_s12] ss:$0 sm:$0xff] }
  0x14   : > { %v318_v7 = vrot.slane %v316_v4, 2  ;;  %v345_v23 = vmul.f32 %v343_v16, %v308_v1  ;;  %v309_v43 = vld [vmem:[%s303_s15] sm:$0x1]  ;;  %v379_v44 = vmul.f32 %v549_v41, %v307_v0 }
  0x15   : > { %v383_v8 = vmul.f32 1.442695, %v382_v5  ;;  %v315_v9 = vsub.f32 %v307_v0, %v313_v6  ;;  %v322_v10 = vadd.f32 %v313_v6, %v307_v0  ;;  %v413_v39 = vmul.f32 %v411_v34, %v307_v0 }
  0x16   : > { %v320_v11 = vsub.f32 %v308_v1, %v318_v7  ;;  %v323_v12 = vadd.f32 %v318_v7, %v308_v1  ;;  %v346_v29 = vadd.f32 %v345_v23, %v341_v22  ;;  %v420_v48 = vrot.slane %v309_v43, %v419_v42 }
  0x17   : > { %569 = vpow2.f32 %v383_v8  ;;  %v414_v45 = vsub.f32 %v372_v38, %v413_v39  ;;  %v380_v49 = vsub.f32 %v372_v38, %v379_v44  ;;  %v438_v22 = vand.u32 127, %v417_v32 }
  0x18   : > { %v321_v13 = vmax.f32 %v315_v9, %v320_v11  ;;  %v324_v14 = vmin.f32 %v322_v10, %v323_v12 }
  0x19   : > { %vm439_vm5 = vcmp.eq.s32.totalorder %v438_v22, 0  ;;  %vm442_vm6 = vcmp.eq.s32.totalorder %v438_v22, 1  ;;  %vm446_vm7 = vcmp.eq.s32.totalorder %v438_v22, 2 }
  0x1a   : > { %vm325_vm0 = vcmp.lt.f32.partialorder %v321_v13, %v324_v14  ;;  %v332_v17 = vsub.f32 %v324_v14, %v321_v13 }
  0x1b   : > { %v326_v19 = vsel %vm325_vm0, 1, %v583_v18 }
  0x1c   : > { %v327_v20 = vrot.slane %v326_v19, 1  ;;  %v334_v21 = vrot.slane %v332_v17, 1 }
  0x1e   : > { %vm328_vm1 = vcmp.ne.s32.totalorder %v327_v20, 0  ;;  %v336_v24 = vmul.f32 %v334_v21, %v332_v17 }
  0x1f   : > { %vm329_vm2 = vmand %vm325_vm0, %vm328_vm1 }
  0x20   : > { %v548_v26 = vsel %vm329_vm2, 1.0, %v584_v25 }
  0x21   : > { %v570_v27 = vpop.eup %569  ;;  %v337_v28 = vmul.f32 %v548_v26, %v336_v24 }
  0x22   : > { %v385_v30 = vadd.f32 1.0, %v570_v27 }
  0x23   : > { %v348_v33 = vrot.slane %v337_v28, 6 }
  0x24   : > { %571 = vlog2.f32 %v385_v30 }
  0x25   : > { %v350_v35 = vsub.f32 %v346_v29, %v348_v33 }
  0x27   : > { %v351_v37 = vadd.f32 1e-16, %v350_v35 }
  0x29   : > { %v353_v40 = vrot.slane %v351_v37, 2 }
  0x2b   : > { %573 = vrcp.f32 %v353_v40 }
  0x2e   : > { %v572_v46 = vpop.eup %571 }
  0x2f   : > { %v387_v47 = vmul.f32 0.6931472, %v572_v46 }
  0x31   : > { %v415_v50 = vadd.f32 %v414_v45, %v387_v47  ;;  %v388_v52 = vadd.f32 %v387_v47, %v380_v49 }
  0x33   : > { %v422_v51 = vmul.f32 %v420_v48, %v415_v50  ;;  %v395_v59 = vmul.f32 %v550_v55, %v388_v52 }
  0x35   : > { %v574_v53 = vpop.eup %573  ;;  %v424_v54 = vrot.slane %v422_v51, 5  ;;  %v397_v62 = vrot.slane %v395_v59, 4 }
  0x36   : > { %v356_v56 = vmul.f32 %v574_v53, %v337_v28 }
  0x37   : > { %v427_v57 = vsel %vm426_vm3, %v424_v54, 0.0  ;;  %v399_v0 = vsel %vm360_vm4, %v397_v62, 0.0 }
  0x38   : > { %428 = vadd.xlane.f32.xlu1 %v427_v57  ;;  %v357_v58 = vmul.f32 %v356_v56, %v356_v56 }
  0x3a   : > { %v358_v60 = vsub.f32 1.0, %v357_v58 }
  0x3c   : > { %v359_v61 = vmul.f32 %v358_v60, %v309_v43 }
  0x3e   : > { %v361_v63 = vsel %vm360_vm4, %v359_v61, 0.0 }
  0x3f   : > { %362 = vadd.xlane.f32.xlu0 %v361_v63 }
  0x43   : > { %400 = vadd.xlane.f32.xlu0 %v399_v0 }
  0xc5   : > { %v429_v1 = vpop.xlane.xlu1 %428 }
  0xc6   : > { %v430_v2 = vrot.slane %v429_v1, 4 }
  0xc8   : > { %v431_v3 = vadd.f32 %v430_v2, %v429_v1 }
  0xca   : > { %v432_v7 = vrot.slane %v431_v3, 2 }
  0xcc   : > { %v363_v4 = vpop.xlane.xlu0 %362  ;;  %v433_v13 = vadd.f32 %v432_v7, %v431_v3 }
  0xcd   : > { %v364_v5 = vrot.slane %v363_v4, 4 }
  0xce   : > { %v434_v18 = vrot.slane %v433_v13, 1 }
  0xcf   : > { %v365_v6 = vadd.f32 %v364_v5, %v363_v4 }
  0xd0   : > { %v401_v8 = vpop.xlane.xlu0 %400  ;;  %v435_v21 = vadd.f32 %v434_v18, %v433_v13 }
  0xd1   : > { %v366_v9 = vrot.slane %v365_v6, 2  ;;  %v402_v10 = vrot.slane %v401_v8, 4 }
  0xd3   : > { %v403_v11 = vadd.f32 %v402_v10, %v401_v8  ;;  %v367_v12 = vadd.f32 %v366_v9, %v365_v6 }
  0xd5   : > { %v404_v14 = vrot.slane %v403_v11, 2  ;;  %v368_v15 = vrot.slane %v367_v12, 1 }
  0xd7   : > { %v405_v16 = vadd.f32 %v404_v14, %v403_v11  ;;  %v369_v17 = vadd.f32 %v368_v15, %v367_v12 }
  0xd9   : > { %553 = vpush %v369_v17  ;;  %v406_v19 = vrot.slane %v405_v16, 1 }
  0xdb   : > { %v407_v20 = vadd.f32 %v406_v19, %v405_v16 }
  0xdd   : > { %555 = vpush %v407_v20 }
  0xde   : > { %557 = vpush %v435_v21 }
 0x10a   : > { %s554_s18 = spop %553 }
 0x10b   : > { %v440_v23 = vstv %s554_s18 }
 0x10c   : > { %v441_v25 = vsel %vm439_vm5, %v440_v23, 0.0 }
 0x10e   : > { %s556_s19 = spop %555 }
 0x10f   : > { %v443_v24 = vstv %s556_s19  ;;  %s558_s20 = spop %557 }
 0x110   : > { %v444_v26 = vsel %vm442_vm6, %v443_v24, 0.0  ;;  %v447_v27 = vstv %s558_s20 }
 0x111   : > { %v445_v28 = vadd.f32 %v444_v26, %v441_v25  ;;  %v448_v29 = vsel %vm446_vm7, %v447_v27, 0.0 }
 0x113   : > { %v449_v30 = vadd.f32 %v448_v29, %v445_v28 }
 0x115   : > { %450 = vst [vmem:[%s306_s25] sm:$0x1] %v449_v30 }
 0x116 PF: > { %s16_s21 = sadd.s32 1, %s581_s21  }
 0x117   : > { %p13_p4 = scmp.ge.s32.totalorder %s16_s21, 4  }
 0x119   :  { %15 = sbr.rel (!%p13_p4) target bundleno = 1 (0x1), region = 86 }

</bundles_post_ra>
